<compile_context>
chip_gen: v7x
topology: tpu7x:2x2x1
jax: 0.10.0
libtpu: 0.0.40
codegen_flags: <defaults>
</compile_context>

<pallas_src>
import jax
import jax.numpy as jnp
from jax import lax
from jax.experimental import pallas as pl
from jax.experimental.pallas import tpu as pltpu

TFACTORS = (0.05, 0.1, 0.15, 0.2)
BN_EPS = 1e-5


# ----------------------------------------------------------------------------
# Weight quantization glue (plain JAX; tiny weight tensors)
# ----------------------------------------------------------------------------
def get_quantized(x, num_bits, m2d):
    qmin = -(2.0 ** (num_bits - 1) - 1)
    qmax = qmin + 2.0 ** num_bits - 2.0
    scale = 2.0 * m2d / (qmax - qmin)
    y = jnp.round(jnp.clip(x / scale, qmin, qmax))   # clamp then round, like torch
    return y * scale


def get_centroid_4d(w, grain_size, num_bits, m2d):
    # Mirrors the 4-D branch of get_centroid: permute(1,2,3,0) -> avg_pool2d
    # with kernel/stride = grain_size -> quantize -> block-broadcast back.
    o, i, kh, kw = w.shape
    g0, g1 = grain_size
    flat = jnp.transpose(w, (1, 2, 3, 0)).reshape(-1, o)            # (I*Kh*Kw, O)
    r = flat.shape[0]
    pooled = flat.reshape(r // g0, g0, o // g1, g1).mean(axis=(1, 3))
    pooled = get_quantized(pooled, num_bits, m2d)
    up = jnp.repeat(jnp.repeat(pooled, g0, axis=0), g1, axis=1)     # (I*Kh*Kw, O)
    return jnp.transpose(up.reshape(i, kh, kw, o), (3, 0, 1, 2))


def quantize_weight(w, tfactor, grain_size, num_bits, m2d):
    centroid = get_centroid_4d(w, grain_size, num_bits, m2d)
    wd = w - centroid
    th = tfactor * jnp.max(jnp.abs(wd))
    wv = 1.0 - m2d
    tern = jnp.where(wd >= th, wv, jnp.where(wd < -th, -wv, 0.0))
    return tern + centroid


def effective_weight(w, grain_size, num_bits, m2d):
    # quanConv2d sums conv outputs over 4 tfactors; conv is linear in the
    # weight, so summing the quantized weights is mathematically identical.
    return sum(quantize_weight(w, t, grain_size, num_bits, m2d) for t in TFACTORS)


def bn_scale_shift(gamma, beta, mean, var, eps=BN_EPS):
    scale = gamma / jnp.sqrt(var + eps)
    shift = beta - mean * scale
    return scale.astype(jnp.float32), shift.astype(jnp.float32)


# ----------------------------------------------------------------------------
# Row block-Toeplitz expansion of a 3x3 HWIO weight on UNPADDED lane rows
# ----------------------------------------------------------------------------
def build_row_toeplitz(w_hwio, w_sp):
    """T[kh] : (W*Cin, W*Cout) maps one lane-flattened input row onto one
    lane-flattened output row; out-of-range kw taps simply have no source
    column (their padding contribution is zero).  K = N = W*C = 128."""
    kh_n, kw_n, cin, cout = w_hwio.shape
    t = jnp.zeros((kh_n, w_sp, cin, w_sp, cout), w_hwio.dtype)
    for kw in range(kw_n):
        for w in range(w_sp):
            src = w + kw - 1
            if 0 <= src < w_sp:
                t = t.at[:, src, :, w, :].set(w_hwio[:, kw])
    return t.reshape(kh_n, w_sp * cin, w_sp * cout)


# ----------------------------------------------------------------------------
# Fused Pallas kernel: conv1+BN1+ReLU -> conv2+BN2(+residual)+ReLU, all in VMEM
# ----------------------------------------------------------------------------
ROW0 = 16   # interior start row inside the bf16 staging scratch; multiple of
            # the bf16 (16,128) sublane tile so the staging store and the
            # centre-tap load are aligned / unmasked.


def fused_basic_block_kernel(x_ref, t1_ref, s1_ref, t2_ref, s2_ref, o_ref,
                             pad_ref):
    # x_ref : (Nb, H, W*C)     f32  lane-flattened NHWC input block (Nb images)
    # t*_ref: (3, W*C, W*C)    bf16 row-Toeplitz conv weights (BN scale folded)
    # s*_ref: (1, W*C)         f32  BN shift, tiled across W
    # o_ref : (Nb, H, W*C)     f32  lane-flattened output block
    # pad_ref: (ROW0+M+16, W*C) bf16 staging scratch, reused for both convs
    nb, h, wc = o_ref.shape
    m = nb * h

    # Off-centre taps read one row above/below each image row.  At an image's
    # first/last row that neighbour is 3x3 SAME padding; in the batch-packed
    # flat layout the shifted slice would otherwise alias the adjacent image
    # (or an unwritten scratch row), so those LHS rows are selected to zero.
    # Re-derived every step on every core (no program_id gating -> megacore safe).
    row = lax.broadcasted_iota(jnp.int32, (m, 1), 0)
    need_top_pad = (row % h) == 0          # kh = 0 tap reads the row above
    need_bot_pad = (row % h) == (h - 1)    # kh = 2 tap reads the row below

    def conv3x3(t_ref, s_ref):
        # 3 MXU matmuls, one per kh tap: (M, W*C) @ (W*C, W*C), bf16 operands,
        # f32 accumulation.  BN scale folded into T; only the shift is added.
        lhs0 = jnp.where(need_top_pad, 0, pad_ref[ROW0 - 1:ROW0 - 1 + m, :])
        acc = jnp.dot(lhs0, t_ref[0], preferred_element_type=jnp.float32)
        acc = acc + jnp.dot(pad_ref[ROW0:ROW0 + m, :], t_ref[1],
                            preferred_element_type=jnp.float32)
        lhs2 = jnp.where(need_bot_pad, 0, pad_ref[ROW0 + 1:ROW0 + 1 + m, :])
        acc = acc + jnp.dot(lhs2, t_ref[2], preferred_element_type=jnp.float32)
        return acc + s_ref[...]

    # conv1 + bn1 + relu : stage x once as bf16 (single pack pass, aligned
    # full-width store; (Nb,H,128)->(Nb*H,128) collapse is layout-free for H=8).
    pad_ref[ROW0:ROW0 + m, :] = x_ref[...].reshape(m, wc).astype(jnp.bfloat16)
    h1 = jnp.maximum(conv3x3(t1_ref, s1_ref), 0.0)

    # conv2 + bn2 + residual + relu : intermediate never leaves VMEM; the
    # f32 residual is re-read from the resident input block.
    pad_ref[ROW0:ROW0 + m, :] = h1.astype(jnp.bfloat16)
    y = conv3x3(t2_ref, s2_ref) + x_ref[...].reshape(m, wc)
    o_ref[...] = jnp.maximum(y, 0.0).reshape(nb, h, wc)


def choose_batch_block(n, h, max_m=256):
    """Largest batch sub-block Nb (divisor of n) with Nb*H <= max_m rows while
    keeping >= 2 grid steps, so both v7x TensorCores get work under 'parallel'
    semantics.  max_m=256 also keeps per-step VMEM (2x-buffered in/out blocks
    + one bf16 scratch + ~200 KiB of weights) far below v7x's 64 MiB."""
    divisors = [d for d in range(1, n + 1) if n % d == 0]
    cands = [d for d in divisors if d * h <= max_m and n // d >= 2]
    if not cands:
        cands = [d for d in divisors if d * h <= max_m] or [1]
    return max(cands)


def fused_basic_block(x_flat, t1, s1, t2, s2):
    n, h, wc = x_flat.shape
    nb = choose_batch_block(n, h)
    m = nb * h
    srows = ROW0 + m + 16
    flops = int(n * 2 * 3 * 2 * h * wc * wc)
    bytes_accessed = int(x_flat.size * 4 + n * h * wc * 4
                         + t1.size * 2 + t2.size * 2 + s1.size * 4 + s2.size * 4)
    return pl.pallas_call(
        fused_basic_block_kernel,
        out_shape=jax.ShapeDtypeStruct((n, h, wc), jnp.float32),
        grid_spec=pltpu.PrefetchScalarGridSpec(
            num_scalar_prefetch=0,
            grid=(n // nb,),          # >= 2 parallel steps feeds both v7x TCs
            in_specs=[
                pl.BlockSpec((nb, h, wc), lambda i: (i, 0, 0)),
                pl.BlockSpec(t1.shape, lambda i: (0, 0, 0)),
                pl.BlockSpec(s1.shape, lambda i: (0, 0)),
                pl.BlockSpec(t2.shape, lambda i: (0, 0, 0)),
                pl.BlockSpec(s2.shape, lambda i: (0, 0)),
            ],
            out_specs=pl.BlockSpec((nb, h, wc), lambda i: (i, 0, 0)),
            scratch_shapes=[
                pltpu.VMEM((srows, wc), jnp.bfloat16),   # shared staging scratch
            ],
        ),
        compiler_params=pltpu.CompilerParams(
            dimension_semantics=("parallel",),
            vmem_limit_bytes=32 * 1024 * 1024,   # safe on v5e/v6e (128 MiB) and v7x (64 MiB)
        ),
        cost_estimate=pl.CostEstimate(
            flops=flops, transcendentals=0, bytes_accessed=bytes_accessed),
    )(x_flat, t1, s1, t2, s2)


# ----------------------------------------------------------------------------
# Parameter preparation (quantize, fold BN scale, Toeplitz-expand, bf16 cast)
# ----------------------------------------------------------------------------
def prepare_block_params(p, w_sp, grain_size, num_bits, m2d):
    def conv_side(w_oihw, gamma, beta, mean, var):
        w_eff = effective_weight(w_oihw.astype(jnp.float32), grain_size, num_bits, m2d)
        scale, shift = bn_scale_shift(gamma, beta, mean, var)
        w_hwio = jnp.transpose(w_eff, (2, 3, 1, 0)) * scale          # fold BN scale over Cout
        w_bf16 = w_hwio.astype(jnp.bfloat16)                         # MXU operand dtype
        t = build_row_toeplitz(w_bf16, w_sp)                         # (3, W*Cin, W*Cout)
        s = jnp.tile(shift, w_sp).reshape(1, w_sp * shift.shape[0]).astype(jnp.float32)
        return w_bf16, t, s, shift

    w1_bf16, t1, s1, b1 = conv_side(p["conv1_w"], p["bn1_gamma"], p["bn1_beta"],
                                    p["bn1_mean"], p["bn1_var"])
    w2_bf16, t2, s2, b2 = conv_side(p["conv2_w"], p["bn2_gamma"], p["bn2_beta"],
                                    p["bn2_mean"], p["bn2_var"])
    return dict(t1=t1, s1=s1, t2=t2, s2=s2,
                w1_bf16=w1_bf16, b1=b1, w2_bf16=w2_bf16, b2=b2)


def basic_block_forward(x_nchw, p, grain_size, num_bits, m2d):
    # BasicBlock with stride=1, downsample=None (inplanes == planes).
    n, c, h, w = x_nchw.shape
    assert p["conv1_w"].shape[0] == c and p["conv2_w"].shape[0] == c, \
        "fused residual path requires inplanes == planes"
    assert (w * c) % 128 == 0, \
        "lane-dense layout requires W*C to be a multiple of 128"
    prep = prepare_block_params(p, w, grain_size, num_bits, m2d)
    x_flat = jnp.transpose(x_nchw, (0, 2, 3, 1)).astype(jnp.float32).reshape(n, h, w * c)
    out_flat = fused_basic_block(x_flat, prep["t1"], prep["s1"], prep["t2"], prep["s2"])
    return jnp.transpose(out_flat.reshape(n, h, w, c), (0, 3, 1, 2))   # NHWC -> NCHW


# ----------------------------------------------------------------------------
# Plain-JAX reference mirroring the kernel numerics (bf16 operands, f32 accum)
# ----------------------------------------------------------------------------
def reference_forward(x_nchw, p, grain_size, num_bits, m2d):
    n, c, h, w = x_nchw.shape
    prep = prepare_block_params(p, w, grain_size, num_bits, m2d)
    x = jnp.transpose(x_nchw, (0, 2, 3, 1)).astype(jnp.float32)        # NHWC

    def conv(inp, w_hwio_bf16):
        return lax.conv_general_dilated(
            inp.astype(jnp.bfloat16), w_hwio_bf16,
            window_strides=(1, 1), padding="SAME",
            dimension_numbers=("NHWC", "HWIO", "NHWC"),
            preferred_element_type=jnp.float32)

    h1 = jnp.maximum(conv(x, prep["w1_bf16"]) + prep["b1"], 0.0)
    y = jnp.maximum(conv(h1, prep["w2_bf16"]) + prep["b2"] + x, 0.0)
    return jnp.transpose(y, (0, 3, 1, 2))


# ----------------------------------------------------------------------------
if __name__ == "__main__":
    N, C, H, W = 32, 16, 8, 8          # W*C = 128 lane-dense; Nb=16 -> M=128, grid=(2,)
    grain_size = (2, 2)
    num_bits = 4
    m2d = 0.25

    key = jax.random.PRNGKey(0)
    ks = jax.random.split(key, 11)
    params = {
        "conv1_w": 0.1 * jax.random.normal(ks[0], (C, C, 3, 3), jnp.float32),
        "conv2_w": 0.1 * jax.random.normal(ks[1], (C, C, 3, 3), jnp.float32),
        "bn1_gamma": 0.5 + jax.random.uniform(ks[2], (C,), jnp.float32),
        "bn1_beta": 0.1 * jax.random.normal(ks[3], (C,), jnp.float32),
        "bn1_mean": 0.1 * jax.random.normal(ks[4], (C,), jnp.float32),
        "bn1_var": 0.5 + jax.random.uniform(ks[5], (C,), jnp.float32),
        "bn2_gamma": 0.5 + jax.random.uniform(ks[6], (C,), jnp.float32),
        "bn2_beta": 0.1 * jax.random.normal(ks[7], (C,), jnp.float32),
        "bn2_mean": 0.1 * jax.random.normal(ks[8], (C,), jnp.float32),
        "bn2_var": 0.5 + jax.random.uniform(ks[9], (C,), jnp.float32),
    }
    x = jax.random.normal(ks[10], (N, C, H, W), jnp.float32)

    out = jax.block_until_ready(basic_block_forward(x, params, grain_size, num_bits, m2d))
    ref = jax.block_until_ready(reference_forward(x, params, grain_size, num_bits, m2d))

    assert out.shape == (N, C, H, W)
    # Kernel and reference share identical bf16 weights / operands with f32
    # accumulation; the only differences are f32 accumulation order and the
    # rare one-ulp bf16 rounding flip of the intermediate activation.  A tap-
    # routing / masking bug would produce errors of order max|ref| itself, so a
    # max-error bound of 2% of the output scale is both safe and discriminative.
    err = float(jnp.max(jnp.abs(out - ref)))
    scale_ref = float(jnp.max(jnp.abs(ref)))
    assert err <= 2e-2 * scale_ref + 1e-3, \
        f"mismatch vs plain-JAX reference: max err {err} (ref scale {scale_ref})"

    print("KERNEL_OK")
</pallas_src>

<mosaic_0001>
module attributes {stable_mosaic.version = 11 : i64} {
  func.func @fused_basic_block_kernel(%arg0: i32, %arg1: memref<16x8x128xf32, #tpu.memory_space<vmem>>, %arg2: memref<3x128x128xbf16, #tpu.memory_space<vmem>>, %arg3: memref<1x128xf32, #tpu.memory_space<vmem>>, %arg4: memref<3x128x128xbf16, #tpu.memory_space<vmem>>, %arg5: memref<1x128xf32, #tpu.memory_space<vmem>>, %arg6: memref<16x8x128xf32, #tpu.memory_space<vmem>>, %arg7: memref<160x128xbf16, #tpu.memory_space<vmem>>) attributes {dimension_semantics = [#tpu.dimension_semantics<parallel>], iteration_bounds = array<i64: 2>, scalar_prefetch = 0 : i64, scratch_operands = 1 : i64, tpu.core_type = #tpu.core_type<tc>, window_params = [{transform_indices = @transform_0, window_bounds = array<i64: 16, 8, 128>}, {pipeline_mode = #tpu.pipeline_mode<synchronous>, transform_indices = @transform_1, window_bounds = array<i64: 3, 128, 128>}, {pipeline_mode = #tpu.pipeline_mode<synchronous>, transform_indices = @transform_2, window_bounds = array<i64: 1, 128>}, {pipeline_mode = #tpu.pipeline_mode<synchronous>, transform_indices = @transform_3, window_bounds = array<i64: 3, 128, 128>}, {pipeline_mode = #tpu.pipeline_mode<synchronous>, transform_indices = @transform_4, window_bounds = array<i64: 1, 128>}, {transform_indices = @transform_5, window_bounds = array<i64: 16, 8, 128>}]} {
    %0 = tpu.iota {dimensions = array<i32: 0>} : vector<128x1xi32>
    %c8_i32 = arith.constant 8 : i32
    %c0_i32 = arith.constant 0 : i32
    %1 = arith.cmpi eq, %c8_i32, %c0_i32 : i32
    %c1_i32 = arith.constant 1 : i32
    %2 = arith.select %1, %c1_i32, %c8_i32 : i32
    %3 = vector.broadcast %2 : i32 to vector<128x1xi32>
    %4 = arith.remsi %0, %3 : vector<128x1xi32>
    %c0_i32_0 = arith.constant 0 : i32
    %5 = vector.broadcast %c0_i32_0 : i32 to vector<128x1xi32>
    %6 = arith.cmpi ne, %4, %5 : vector<128x1xi32>
    %c0_i32_1 = arith.constant 0 : i32
    %7 = vector.broadcast %c0_i32_1 : i32 to vector<128x1xi32>
    %8 = arith.cmpi slt, %4, %7 : vector<128x1xi32>
    %c0_i32_2 = arith.constant 0 : i32
    %9 = arith.cmpi slt, %2, %c0_i32_2 : i32
    %10 = vector.broadcast %9 : i1 to vector<128x1xi1>
    %11 = vector.broadcast %10 : vector<128x1xi1> to vector<128x1xi1>
    %12 = arith.xori %8, %11 : vector<128x1xi1>
    %13 = arith.andi %12, %6 : vector<128x1xi1>
    %14 = vector.broadcast %2 : i32 to vector<128x1xi32>
    %15 = arith.addi %4, %14 : vector<128x1xi32>
    %16 = arith.select %13, %15, %4 : vector<128x1xi1>, vector<128x1xi32>
    %c0_i32_3 = arith.constant 0 : i32
    %17 = vector.broadcast %c0_i32_3 : i32 to vector<128x1xi32>
    %18 = arith.cmpi eq, %16, %17 : vector<128x1xi32>
    %c8_i32_4 = arith.constant 8 : i32
    %c0_i32_5 = arith.constant 0 : i32
    %19 = arith.cmpi eq, %c8_i32_4, %c0_i32_5 : i32
    %c1_i32_6 = arith.constant 1 : i32
    %20 = arith.select %19, %c1_i32_6, %c8_i32_4 : i32
    %21 = vector.broadcast %20 : i32 to vector<128x1xi32>
    %22 = arith.remsi %0, %21 : vector<128x1xi32>
    %c0_i32_7 = arith.constant 0 : i32
    %23 = vector.broadcast %c0_i32_7 : i32 to vector<128x1xi32>
    %24 = arith.cmpi ne, %22, %23 : vector<128x1xi32>
    %c0_i32_8 = arith.constant 0 : i32
    %25 = vector.broadcast %c0_i32_8 : i32 to vector<128x1xi32>
    %26 = arith.cmpi slt, %22, %25 : vector<128x1xi32>
    %c0_i32_9 = arith.constant 0 : i32
    %27 = arith.cmpi slt, %20, %c0_i32_9 : i32
    %28 = vector.broadcast %27 : i1 to vector<128x1xi1>
    %29 = vector.broadcast %28 : vector<128x1xi1> to vector<128x1xi1>
    %30 = arith.xori %26, %29 : vector<128x1xi1>
    %31 = arith.andi %30, %24 : vector<128x1xi1>
    %32 = vector.broadcast %20 : i32 to vector<128x1xi32>
    %33 = arith.addi %22, %32 : vector<128x1xi32>
    %34 = arith.select %31, %33, %22 : vector<128x1xi1>, vector<128x1xi32>
    %c7_i32 = arith.constant 7 : i32
    %35 = vector.broadcast %c7_i32 : i32 to vector<128x1xi32>
    %36 = arith.cmpi eq, %34, %35 : vector<128x1xi32>
    %c0 = arith.constant 0 : index
    %c0_10 = arith.constant 0 : index
    %c0_11 = arith.constant 0 : index
    %37 = vector.load %arg1[%c0, %c0_10, %c0_11] : memref<16x8x128xf32, #tpu.memory_space<vmem>>, vector<16x8x128xf32>
    %38 = vector.shape_cast %37 : vector<16x8x128xf32> to vector<128x128xf32>
    %39 = arith.truncf %38 : vector<128x128xf32> to vector<128x128xbf16>
    %c16 = arith.constant 16 : index
    %c0_12 = arith.constant 0 : index
    %40 = vector.load %arg7[%c16, %c0_12] : memref<160x128xbf16, #tpu.memory_space<vmem>>, vector<128x128xbf16>
    tpu.vector_store %arg7[%c16, %c0_12], %39 {strides = array<i32>} : memref<160x128xbf16, #tpu.memory_space<vmem>>, vector<128x128xbf16>,
    %c15 = arith.constant 15 : index
    %c0_13 = arith.constant 0 : index
    %41 = vector.load %arg7[%c15, %c0_13] : memref<160x128xbf16, #tpu.memory_space<vmem>>, vector<128x128xbf16>
    %c0_i32_14 = arith.constant 0 : i32
    %42 = arith.sitofp %c0_i32_14 : i32 to bf16
    %43 = vector.shape_cast %18 : vector<128x1xi1> to vector<128x1xi1>
    %44 = vector.broadcast %43 : vector<128x1xi1> to vector<128x128xi1>
    %45 = vector.broadcast %42 : bf16 to vector<128x128xbf16>
    %46 = arith.select %44, %45, %41 : vector<128x128xi1>, vector<128x128xbf16>
    %c0_15 = arith.constant 0 : index
    %c0_16 = arith.constant 0 : index
    %c0_17 = arith.constant 0 : index
    %47 = vector.load %arg2[%c0_15, %c0_16, %c0_17] : memref<3x128x128xbf16, #tpu.memory_space<vmem>>, vector<1x128x128xbf16>
    %48 = vector.shape_cast %47 : vector<1x128x128xbf16> to vector<128x128xbf16>
    %cst = arith.constant dense<0.000000e+00> : vector<128x128xf32>
    %49 = tpu.matmul %46, %48, %cst {dimension_numbers = #tpu.dot_dimension_numbers<[1], [0], [0], [1], [0, 0, 1, 1], [], []>} : vector<128x128xbf16>, vector<128x128xbf16>, vector<128x128xf32> -> vector<128x128xf32>
    %c16_18 = arith.constant 16 : index
    %c0_19 = arith.constant 0 : index
    %50 = vector.load %arg7[%c16_18, %c0_19] : memref<160x128xbf16, #tpu.memory_space<vmem>>, vector<128x128xbf16>
    %c1 = arith.constant 1 : index
    %c0_20 = arith.constant 0 : index
    %c0_21 = arith.constant 0 : index
    %51 = vector.load %arg2[%c1, %c0_20, %c0_21] : memref<3x128x128xbf16, #tpu.memory_space<vmem>>, vector<1x128x128xbf16>
    %52 = vector.shape_cast %51 : vector<1x128x128xbf16> to vector<128x128xbf16>
    %cst_22 = arith.constant dense<0.000000e+00> : vector<128x128xf32>
    %53 = tpu.matmul %50, %52, %cst_22 {dimension_numbers = #tpu.dot_dimension_numbers<[1], [0], [0], [1], [0, 0, 1, 1], [], []>} : vector<128x128xbf16>, vector<128x128xbf16>, vector<128x128xf32> -> vector<128x128xf32>
    %54 = arith.addf %49, %53 : vector<128x128xf32>
    %c17 = arith.constant 17 : index
    %c0_23 = arith.constant 0 : index
    %55 = vector.load %arg7[%c17, %c0_23] : memref<160x128xbf16, #tpu.memory_space<vmem>>, vector<128x128xbf16>
    %c0_i32_24 = arith.constant 0 : i32
    %56 = arith.sitofp %c0_i32_24 : i32 to bf16
    %57 = vector.shape_cast %36 : vector<128x1xi1> to vector<128x1xi1>
    %58 = vector.broadcast %57 : vector<128x1xi1> to vector<128x128xi1>
    %59 = vector.broadcast %56 : bf16 to vector<128x128xbf16>
    %60 = arith.select %58, %59, %55 : vector<128x128xi1>, vector<128x128xbf16>
    %c2 = arith.constant 2 : index
    %c0_25 = arith.constant 0 : index
    %c0_26 = arith.constant 0 : index
    %61 = vector.load %arg2[%c2, %c0_25, %c0_26] : memref<3x128x128xbf16, #tpu.memory_space<vmem>>, vector<1x128x128xbf16>
    %62 = vector.shape_cast %61 : vector<1x128x128xbf16> to vector<128x128xbf16>
    %cst_27 = arith.constant dense<0.000000e+00> : vector<128x128xf32>
    %63 = tpu.matmul %60, %62, %cst_27 {dimension_numbers = #tpu.dot_dimension_numbers<[1], [0], [0], [1], [0, 0, 1, 1], [], []>} : vector<128x128xbf16>, vector<128x128xbf16>, vector<128x128xf32> -> vector<128x128xf32>
    %64 = arith.addf %54, %63 : vector<128x128xf32>
    %c0_28 = arith.constant 0 : index
    %c0_29 = arith.constant 0 : index
    %65 = vector.load %arg3[%c0_28, %c0_29] : memref<1x128xf32, #tpu.memory_space<vmem>>, vector<1x128xf32>
    %66 = vector.broadcast %65 : vector<1x128xf32> to vector<128x128xf32>
    %67 = arith.addf %64, %66 : vector<128x128xf32>
    %cst_30 = arith.constant 0.000000e+00 : f32
    %68 = vector.broadcast %cst_30 : f32 to vector<128x128xf32>
    %69 = arith.maximumf %67, %68 : vector<128x128xf32>
    %70 = arith.truncf %69 : vector<128x128xf32> to vector<128x128xbf16>
    %c16_31 = arith.constant 16 : index
    %c0_32 = arith.constant 0 : index
    %71 = vector.load %arg7[%c16_31, %c0_32] : memref<160x128xbf16, #tpu.memory_space<vmem>>, vector<128x128xbf16>
    tpu.vector_store %arg7[%c16_31, %c0_32], %70 {strides = array<i32>} : memref<160x128xbf16, #tpu.memory_space<vmem>>, vector<128x128xbf16>,
    %c15_33 = arith.constant 15 : index
    %c0_34 = arith.constant 0 : index
    %72 = vector.load %arg7[%c15_33, %c0_34] : memref<160x128xbf16, #tpu.memory_space<vmem>>, vector<128x128xbf16>
    %c0_i32_35 = arith.constant 0 : i32
    %73 = arith.sitofp %c0_i32_35 : i32 to bf16
    %74 = vector.shape_cast %18 : vector<128x1xi1> to vector<128x1xi1>
    %75 = vector.broadcast %74 : vector<128x1xi1> to vector<128x128xi1>
    %76 = vector.broadcast %73 : bf16 to vector<128x128xbf16>
    %77 = arith.select %75, %76, %72 : vector<128x128xi1>, vector<128x128xbf16>
    %c0_36 = arith.constant 0 : index
    %c0_37 = arith.constant 0 : index
    %c0_38 = arith.constant 0 : index
    %78 = vector.load %arg4[%c0_36, %c0_37, %c0_38] : memref<3x128x128xbf16, #tpu.memory_space<vmem>>, vector<1x128x128xbf16>
    %79 = vector.shape_cast %78 : vector<1x128x128xbf16> to vector<128x128xbf16>
    %cst_39 = arith.constant dense<0.000000e+00> : vector<128x128xf32>
    %80 = tpu.matmul %77, %79, %cst_39 {dimension_numbers = #tpu.dot_dimension_numbers<[1], [0], [0], [1], [0, 0, 1, 1], [], []>} : vector<128x128xbf16>, vector<128x128xbf16>, vector<128x128xf32> -> vector<128x128xf32>
    %c16_40 = arith.constant 16 : index
    %c0_41 = arith.constant 0 : index
    %81 = vector.load %arg7[%c16_40, %c0_41] : memref<160x128xbf16, #tpu.memory_space<vmem>>, vector<128x128xbf16>
    %c1_42 = arith.constant 1 : index
    %c0_43 = arith.constant 0 : index
    %c0_44 = arith.constant 0 : index
    %82 = vector.load %arg4[%c1_42, %c0_43, %c0_44] : memref<3x128x128xbf16, #tpu.memory_space<vmem>>, vector<1x128x128xbf16>
    %83 = vector.shape_cast %82 : vector<1x128x128xbf16> to vector<128x128xbf16>
    %cst_45 = arith.constant dense<0.000000e+00> : vector<128x128xf32>
    %84 = tpu.matmul %81, %83, %cst_45 {dimension_numbers = #tpu.dot_dimension_numbers<[1], [0], [0], [1], [0, 0, 1, 1], [], []>} : vector<128x128xbf16>, vector<128x128xbf16>, vector<128x128xf32> -> vector<128x128xf32>
    %85 = arith.addf %80, %84 : vector<128x128xf32>
    %c17_46 = arith.constant 17 : index
    %c0_47 = arith.constant 0 : index
    %86 = vector.load %arg7[%c17_46, %c0_47] : memref<160x128xbf16, #tpu.memory_space<vmem>>, vector<128x128xbf16>
    %c0_i32_48 = arith.constant 0 : i32
    %87 = arith.sitofp %c0_i32_48 : i32 to bf16
    %88 = vector.shape_cast %36 : vector<128x1xi1> to vector<128x1xi1>
    %89 = vector.broadcast %88 : vector<128x1xi1> to vector<128x128xi1>
    %90 = vector.broadcast %87 : bf16 to vector<128x128xbf16>
    %91 = arith.select %89, %90, %86 : vector<128x128xi1>, vector<128x128xbf16>
    %c2_49 = arith.constant 2 : index
    %c0_50 = arith.constant 0 : index
    %c0_51 = arith.constant 0 : index
    %92 = vector.load %arg4[%c2_49, %c0_50, %c0_51] : memref<3x128x128xbf16, #tpu.memory_space<vmem>>, vector<1x128x128xbf16>
    %93 = vector.shape_cast %92 : vector<1x128x128xbf16> to vector<128x128xbf16>
    %cst_52 = arith.constant dense<0.000000e+00> : vector<128x128xf32>
    %94 = tpu.matmul %91, %93, %cst_52 {dimension_numbers = #tpu.dot_dimension_numbers<[1], [0], [0], [1], [0, 0, 1, 1], [], []>} : vector<128x128xbf16>, vector<128x128xbf16>, vector<128x128xf32> -> vector<128x128xf32>
    %95 = arith.addf %85, %94 : vector<128x128xf32>
    %c0_53 = arith.constant 0 : index
    %c0_54 = arith.constant 0 : index
    %96 = vector.load %arg5[%c0_53, %c0_54] : memref<1x128xf32, #tpu.memory_space<vmem>>, vector<1x128xf32>
    %97 = vector.broadcast %96 : vector<1x128xf32> to vector<128x128xf32>
    %98 = arith.addf %95, %97 : vector<128x128xf32>
    %c0_55 = arith.constant 0 : index
    %c0_56 = arith.constant 0 : index
    %c0_57 = arith.constant 0 : index
    %99 = vector.load %arg1[%c0_55, %c0_56, %c0_57] : memref<16x8x128xf32, #tpu.memory_space<vmem>>, vector<16x8x128xf32>
    %100 = vector.shape_cast %99 : vector<16x8x128xf32> to vector<128x128xf32>
    %101 = arith.addf %98, %100 : vector<128x128xf32>
    %cst_58 = arith.constant 0.000000e+00 : f32
    %102 = vector.broadcast %cst_58 : f32 to vector<128x128xf32>
    %103 = arith.maximumf %101, %102 : vector<128x128xf32>
    %104 = vector.shape_cast %103 : vector<128x128xf32> to vector<16x8x128xf32>
    %c0_59 = arith.constant 0 : index
    %c0_60 = arith.constant 0 : index
    %c0_61 = arith.constant 0 : index
    %105 = vector.load %arg6[%c0_59, %c0_60, %c0_61] : memref<16x8x128xf32, #tpu.memory_space<vmem>>, vector<16x8x128xf32>
    tpu.vector_store %arg6[%c0_59, %c0_60, %c0_61], %104 {strides = array<i32>} : memref<16x8x128xf32, #tpu.memory_space<vmem>>, vector<16x8x128xf32>,
    return
  }
  func.func @transform_0(%arg0: i32) -> (i32, i32, i32) {
    %c0_i32 = arith.constant 0 : i32
    %c0_i32_0 = arith.constant 0 : i32
    %c0_i32_1 = arith.constant 0 : i32
    return %arg0, %c0_i32, %c0_i32_0 : i32, i32, i32
  }
  func.func @transform_1(%arg0: i32) -> (i32, i32, i32) {
    %c0_i32 = arith.constant 0 : i32
    %c0_i32_0 = arith.constant 0 : i32
    %c0_i32_1 = arith.constant 0 : i32
    %c0_i32_2 = arith.constant 0 : i32
    return %c0_i32, %c0_i32_0, %c0_i32_1 : i32, i32, i32
  }
  func.func @transform_2(%arg0: i32) -> (i32, i32) {
    %c0_i32 = arith.constant 0 : i32
    %c0_i32_0 = arith.constant 0 : i32
    %c0_i32_1 = arith.constant 0 : i32
    return %c0_i32, %c0_i32_0 : i32, i32
  }
  func.func @transform_3(%arg0: i32) -> (i32, i32, i32) {
    %c0_i32 = arith.constant 0 : i32
    %c0_i32_0 = arith.constant 0 : i32
    %c0_i32_1 = arith.constant 0 : i32
    %c0_i32_2 = arith.constant 0 : i32
    return %c0_i32, %c0_i32_0, %c0_i32_1 : i32, i32, i32
  }
  func.func @transform_4(%arg0: i32) -> (i32, i32) {
    %c0_i32 = arith.constant 0 : i32
    %c0_i32_0 = arith.constant 0 : i32
    %c0_i32_1 = arith.constant 0 : i32
    return %c0_i32, %c0_i32_0 : i32, i32
  }
  func.func @transform_5(%arg0: i32) -> (i32, i32, i32) {
    %c0_i32 = arith.constant 0 : i32
    %c0_i32_0 = arith.constant 0 : i32
    %c0_i32_1 = arith.constant 0 : i32
    return %arg0, %c0_i32, %c0_i32_0 : i32, i32, i32
  }
}

</mosaic_0001>

<bundles_post_ra>
// kernel: tpu_custom_call.1
= control target key start
LH: loop header
LB: loop body
LE: loop exit
PB: predicated region body
PF: predicated region fallthrough
CT: control target
= control target key end

     0   :  { %10 = vsyncpa [#allocation4], 0  ;;  %s4380_s0 = inlined_call_operand.hbm [shape: f32[32,8,128], index: 0, kind: input, shape index: {}]   ;;  %s4381_s1 = inlined_call_operand.hbm [shape: bf16[3,128,128], index: 1, kind: input, shape index: {}]   ;;  %s4382_s2 = inlined_call_operand.vmem [shape: f32[1,128], index: 2, kind: input, shape index: {}]   ;;  %s4383_s3 = inlined_call_operand.hbm [shape: bf16[3,128,128], index: 3, kind: input, shape index: {}]   ;;  %s4384_s4 = inlined_call_operand.vmem [shape: f32[1,128], index: 4, kind: input, shape index: {}]   ;;  %s4385_s5 = inlined_call_operand.hbm [shape: f32[32,8,128], index: 5, kind: output, shape index: {}]  }
   0x1   :  { %12 = vsyncpa [#allocation4 + $0x1], 0 }
   0x2   :  { %13 = vsyncpa [#allocation7], 0 }
   0x3   :  { %14 = vsyncpa [#allocation5], 0 }
   0x4   :  { %16 = vsyncpa [#allocation5 + $0x1], 0  ;;  %s3257_s18 = smov 0   ;;  %s3259_s19 = smov 0  }
   0x5   :  { %s3261_s20 = smov 0   ;;  %s3263_s21 = smov 0  }
   0x6 LB: > { %s3278_s22 = sadd.s32 4294967295, %s3214_s21   ;;  %s2498_s23 = sadd.s32 4294967294, %s3214_s21   ;;  %s3214_s21 = sphi %s3263_s21, %s4477_s21   ;;  %s3210_s20 = sphi %s3261_s20, %s4476_s20   ;;  %s3206_s19 = sphi %s3259_s19, %s4475_s19   ;;  %s3202_s18 = sphi %s3257_s18, %s4474_s18  }
   0x7   : > { %p42_p0 = scmp.ne.s32.totalorder %s3206_s19, %s3202_s18  ;;  %p4386_p1 = scmp.eq.s32.totalorder %s3278_s22, 0 }
   0x8   : > { %p156_p3 = scmp.eq.s32.totalorder %s2498_s23, 1  ;;  %p2499_p5 = scmp.ge.s32.totalorder %s3214_s21, 1 }
   0x9   : > { %p3287_p4 = por %p4386_p1, %p42_p0  ;;  %p163_p7 = scmp.lt.s32.totalorder %s3214_s21, 3 }
   0xa   : > { %p3292_p6 = por %p156_p3, %p42_p0  ;;  %s3216_s27 = smov [#allocation6]  }
   0xb   : > { %s4396_s24 = scalar_select %p3287_p4, 1, 0 }
   0xc   : > { %s4397_s25 = scalar_select %p3292_p6, 1, 0 }
   0xd   : > { %p3297_p8 = pnand %p2499_p5, %p163_p7  ;;  %s175_s28 = sshll.u32 %s3216_s27, 4  ;;  %s3301_s28 = int_to_ptr.vmem [resolvable:$true] %s175_s28 }
   0xe   : > { %s3217_s30 = smov [#allocation8]   ;;  %s3058_s9 = scalar_lea.hbm %s4381_s1, 3072 }
   0xf   : > { %p2948_p9 = pneg %p3297_p8  ;;  %s191_s6 = sshll.u32 %s3217_s30, 4  ;;  %s3312_s6 = int_to_ptr.vmem [resolvable:$true] %s191_s6 }
  0x10   : > { %p3059_p12 = scmp.ne.s32.totalorder %s4381_s1, %s3058_s9  ;;  %p3065_p5 = scmp.lt.u32.totalorder %s3058_s9, %s4381_s1 }
  0x11   : > { %p3308_p11 = pnand %p2948_p9, %p4386_p1 }
  0x13   : > { %p3060_p13 = pneg %p3308_p11 }
  0x15   : > { %p3061_p0 = pnand %p3060_p13, %p3059_p12 }
  0x17   : > { %p3062_p3 = pneg %p3061_p0 }
  0x19   : > { %p3067_p7 = pnand %p3065_p5, %p3062_p3 }
  0x1b   : > { %3070 = shalt.err (!%p3067_p7)
}
  0x1c   : > { %s3071_s14 = scalar_lea.vmem %s3301_s28, 3072  ;;  %p3079_p2 = scmp.lt.s32.totalorder %s3301_s28, %s3301_s28 }
  0x1d   : > { %p3072_p9 = scmp.ne.s32.totalorder %s3301_s28, %s3071_s14  ;;  %p3080_p12 = scmp.lt.s32.totalorder %s3071_s14, %s3071_s14 }
  0x1f   : > { %p3074_p10 = pnand %p3072_p9, %p3060_p13  ;;  %p3081_p0 = por %p3080_p12, %p3079_p2 }
  0x21   : > { %p3075_p1 = pneg %p3074_p10 }
  0x23   : > { %p3082_p6 = pnand %p3081_p0, %p3075_p1 }
  0x25   : > { %3085 = shalt.err (!%p3082_p6)
}
  0x26   : > { %s3218_s15 = smov 64   ;;  %s3219_s16 = smov 4  }
  0x27   : > { %2951 = dma.hbm_to_vmem [thread:$0]  (!%p3308_p11), %s4381_s1, 3072, %s3301_s28, [#allocation7], %s3218_s15, %s3218_s15, %s3219_s16  }
  0x28   : > { %s3086_s7 = scalar_lea.hbm %s4383_s3, 3072 }
  0x29   : > { %p3087_p2 = scmp.ne.s32.totalorder %s4383_s3, %s3086_s7  ;;  %p3093_p10 = scmp.lt.u32.totalorder %s3086_s7, %s4383_s3 }
  0x2b   : > { %p3089_p1 = pnand %p3087_p2, %p3060_p13 }
  0x2d   : > { %p3090_p6 = pneg %p3089_p1 }
  0x2f   : > { %p3095_p3 = pnand %p3093_p10, %p3090_p6 }
  0x31   : > { %3098 = shalt.err (!%p3095_p3)
}
  0x32   : > { %s3099_s28 = scalar_lea.vmem %s3312_s6, 3072  ;;  %p3107_p12 = scmp.lt.s32.totalorder %s3312_s6, %s3312_s6 }
  0x33   : > { %p3100_p5 = scmp.ne.s32.totalorder %s3312_s6, %s3099_s28  ;;  %p3108_p0 = scmp.lt.s32.totalorder %s3099_s28, %s3099_s28 }
  0x35   : > { %p3102_p7 = pnand %p3100_p5, %p3060_p13  ;;  %p3109_p2 = por %p3108_p0, %p3107_p12 }
  0x37   : > { %p3103_p9 = pneg %p3102_p7 }
  0x39   : > { %p3110_p1 = pnand %p3109_p2, %p3103_p9 }
  0x3b   : > { %3113 = shalt.err (!%p3110_p1)
}
  0x3c   : > { %2954 = dma.hbm_to_vmem [thread:$0]  (!%p3308_p11), %s4383_s3, 3072, %s3312_s6, [#allocation7], %s3218_s15, %s3218_s15, %s3219_s16  }
  0x3d   : > { %s3367_s14 = sadd.s32 1, %s3214_s21   ;;  %s29_s29 = sadd.s32 1, %s3210_s20 }
  0x3e   : > { %s26_s17 = ssub.s32 %s3214_s21, %s3367_s14  ;;  %p36_p13 = scmp.ne.s32.totalorder %s3210_s20, %s3206_s19 }
  0x3f   : > { %p27_p6 = scmp.eq.s32.totalorder %s26_s17, 0  ;;  %p37_p10 = scmp.eq.s32.totalorder %s3214_s21, 0 }
  0x40   : > { %p4400_p3 = scmp.eq.s32.totalorder %s3278_s22, 1  ;;  %p2965_p7 = scmp.lt.s32.totalorder %s3214_s21, 2 }
  0x41   : > { %s3383_s27 = scalar_select %p27_p6, %s3210_s20, %s29_s29  }
  0x42   : > { %p3377_p5 = por %p4400_p3, %p36_p13  ;;  %p38_p9 = por %p37_p10, %p36_p13 }
  0x43   : > { %s208_s30 = sand.u32 1, %s3210_s20   ;;  %s2582_s6 = sshll.u32 %s3214_s21, 11 }
  0x44   : > { %s4401_s23 = scalar_select %p3377_p5, 1, 0 }
  0x45   : > { %s2503_s7 = sshll.u32 %s208_s30, 7  ;;  %s3390_s8 = scalar_lea.hbm %s4380_s0, %s2582_s6 }
  0x46   : > { %s212_s9 = scalar_lea.vmem [#allocation3], %s2503_s7  ;;  %p3394_p11 = pnand %p2965_p7, %p38_p9 }
  0x47   : > { %s219_s10 = sshll.u32 %s212_s9, 4  ;;  %s3398_s28 = scalar_lea.sflag [#allocation4], %s208_s30  ;;  %s3392_s10 = int_to_ptr.vmem [resolvable:$true] %s219_s10 }
  0x48   : > { %s3114_s12 = scalar_lea.hbm %s3390_s8, 2048  ;;  %p3116_p0 = pneg %p3394_p11 }
  0x49   : > { %p3115_p12 = scmp.ne.s32.totalorder %s3390_s8, %s3114_s12  ;;  %s3119_s17 = scalar_lea.hbm %s4380_s0, 4096 }
  0x4a   : > { %p3120_p13 = scmp.lt.u32.totalorder %s3390_s8, %s4380_s0  ;;  %p3121_p6 = scmp.lt.u32.totalorder %s3119_s17, %s3114_s12 }
  0x4b   : > { %p3117_p2 = pnand %p3116_p0, %p3115_p12  ;;  %p3123_p3 = scmp.lt.u32.totalorder %s3114_s12, %s3390_s8 }
  0x4c   : > { %p3122_p10 = por %p3121_p6, %p3120_p13 }
  0x4d   : > { %p3118_p1 = pneg %p3117_p2 }
  0x4e   : > { %p3124_p7 = por %p3123_p3, %p3122_p10 }
  0x50   : > { %p3125_p9 = pnand %p3124_p7, %p3118_p1 }
  0x52   : > { %3128 = shalt.err (!%p3125_p9)
}
  0x53   : > { %s3129_s30 = scalar_lea.vmem %s3392_s10, 2048  ;;  %s3220_s15 = smov [#allocation3]  }
  0x54   : > { %p3130_p12 = scmp.ne.s32.totalorder %s3392_s10, %s3129_s30  ;;  %s3134_s16 = sshll.u32 %s3220_s15, 4  ;;  %s3135_s16 = int_to_ptr.vmem [resolvable:$false] %s3134_s16 }
  0x55   : > { %s3136_s9 = scalar_lea.vmem %s3135_s16, 4096  ;;  %p3137_p4 = scmp.lt.s32.totalorder %s3392_s10, %s3135_s16 }
  0x56   : > { %p3132_p2 = pnand %p3130_p12, %p3116_p0  ;;  %p3138_p13 = scmp.lt.s32.totalorder %s3136_s9, %s3129_s30 }
  0x58   : > { %p3133_p5 = pneg %p3132_p2  ;;  %p3139_p6 = por %p3138_p13, %p3137_p4 }
  0x5a   : > { %p3140_p10 = pnand %p3139_p6, %p3133_p5 }
  0x5c   : > { %3143 = shalt.err (!%p3140_p10)
}
  0x5d   : > { %s3221_s12 = smov 128   ;;  %s3222_s13 = smov 8  }
  0x5e   : > { %2958 = dma.hbm_to_vmem [thread:$0]  (!%p3394_p11), %s3390_s8, 2048, %s3392_s10, %s3398_s28, %s3221_s12, %s3221_s12, %s3222_s13  }
  0x5f   : > { %231 = sbr.rel (%p3297_p8) target bundleno = 749 (0x2ed), region = 40  ;;  %s3429_s29 = sand.u32 (!%p3297_p8), 1, %s3206_s19  }
  0x60   : > { %s2507_s17 = sshll.u32 (!%p3297_p8), %s3429_s29, 7  ;;  %s234_s7 = scalar_lea.sflag (!%p3297_p8), [#allocation4], %s3429_s29 }
  0x61   : > { %s3435_s6 = scalar_lea.vmem (!%p3297_p8), [#allocation3], %s2507_s17  ;;  %p4403_p4 = scmp.ne.s32.totalorder (!%p3297_p8), %s4396_s24, 0 }
  0x66   : > { %3189 = dma.done.wait (%p4403_p4), %s234_s7, 2048  }
  0x67   : > { %3191 = vsyncadd (%p4403_p4), %s234_s7, 4294965248  ;;  %p4404_p5 = scmp.eq.s32.totalorder %s3278_s22, 0 }
  0x69   : > { %3193 = dma.done.wait (%p4404_p5), [#allocation7], 6144   ;;  %p4405_p8 = pmov %p4404_p5 }
  0x6a   : > { %v277_v0 = vlaneseq  ;;  %v3010_v4 = vld [vmem:[#allocation6 + $0x40] sm:$0xff]   ;;  %v3011_v6 = vld [vmem:[#allocation6 + $0x48] sm:$0xff]   ;;  %v3012_v10 = vld [vmem:[#allocation6 + $0x50] sm:$0xff]   ;;  %v3223_v22 = vmov 0   ;;  %s4287_s11 = scalar_lea.vmem [#allocation9], %s2507_s17  ;;  %s2583_s28 = sshll.u32 %s3278_s22, 11 }
  0x6b   : > { %3195 = vsyncadd (%p4405_p8), [#allocation7], 4294961152  ;;  %2680 = vmatprep.subr.bf16.mxu0 %v3010_v4  ;;  %v3013_v15 = vld [vmem:[#allocation6 + $0x58] sm:$0xff]   ;;  %v518_v18 = vld [vmem:[%s3435_s6] sm:$0xff]  ;;  %s2406_s30 = sshll.u32 %s4287_s11, 4  ;;  %s4331_s9 = scalar_lea.hbm %s4385_s5, %s2583_s28  ;;  %s4333_s30 = int_to_ptr.vmem [resolvable:$true] %s2406_s30 }
  0x6c   : > { %v3445_v1 = vshrl.u32 %v277_v0, 7  ;;  %2681 = vmatpush3.bf16.msra.mxu0 %v3010_v4  ;;  %v519_v19 = vld [vmem:[%s3435_s6 + $0x8] sm:$0xff]  ;;  %v3014_v29 = vld [vmem:[#allocation6 + $0x60] sm:$0xff]   ;;  %v3016_v52 = vld [vmem:[#allocation6 + $0x70] sm:$0xff]   ;;  %s2393_s22 = scalar_lea.sflag [#allocation5], %s3429_s29  ;;  %s3144_s12 = scalar_lea.vmem %s4333_s30, 2048 }
  0x6d   : > { %2682 = vmatprep.subr.bf16.mxu0 %v3011_v6  ;;  %v3495_v21 = vpack.c.bf16 %v519_v19, %v518_v18  ;;  %v3015_v41 = vld [vmem:[#allocation6 + $0x68] sm:$0xff]   ;;  %v3017_v61 = vld [vmem:[#allocation6 + $0x78] sm:$0xff]   ;;  %v520_v0 = vld [vmem:[%s3435_s6 + $0x10] sm:$0xff]  ;;  %p3145_p11 = scmp.ne.s32.totalorder %s4333_s30, %s3144_s12  ;;  %p4471_p0 = scmp.ne.s32.totalorder %s4401_s23, 0 }
  0x6e   : > { %v3448_v2 = vadd.s32 8, %v3445_v1  ;;  %v3451_v3 = vadd.s32 16, %v3445_v1  ;;  %v3454_v5 = vadd.s32 24, %v3445_v1  ;;  %v298_v7 = vand.u32 7, %v3445_v1  ;;  %v522_v16 = vld [vmem:[%s3435_s6 + $0x20] sm:$0xff]  ;;  %v523_v17 = vld [vmem:[%s3435_s6 + $0x28] sm:$0xff] }
  0x6f   : > { %v3473_v14 = vadd.s32 32, %v3445_v1  ;;  %v3493_v20 = vadd.s32 40, %v3445_v1  ;;  %v3502_v24 = vadd.s32 48, %v3445_v1  ;;  %v3509_v26 = vadd.s32 56, %v3445_v1  ;;  %2696 = vmatprep.mubr.bf16.mxu0 %v3495_v21  ;;  %v3019_v42 = vld [vmem:[#allocation6 + $0x8] sm:$0xff]   ;;  %v524_v46 = vld [vmem:[%s3435_s6 + $0x30] sm:$0xff]  ;;  %p3146_p1 = pnand %p3145_p11, %p4471_p0 }
  0x70   : > { %v305_v8 = vand.u32 7, %v3448_v2  ;;  %v312_v9 = vand.u32 7, %v3451_v3  ;;  %v319_v11 = vand.u32 7, %v3454_v5  ;;  %vm3462_vm0 = vcmp.eq.s32.totalorder %v298_v7, 0  ;;  %2683 = vmatpush3.bf16.msra.mxu0 %v3011_v6  ;;  %v526_v53 = vld [vmem:[%s3435_s6 + $0x40] sm:$0xff]  ;;  %v527_v60 = vld [vmem:[%s3435_s6 + $0x48] sm:$0xff] }
  0x71   : > { %2684 = vmatprep.subr.bf16.mxu0 %v3012_v10  ;;  %vm591_vm4 = vmpackc.low %vm3462_vm0, %vm3462_vm0  ;;  %v326_v28 = vand.u32 7, %v3473_v14  ;;  %v333_v32 = vand.u32 7, %v3493_v20  ;;  %v340_v33 = vand.u32 7, %v3502_v24  ;;  %v3521_v34 = vadd.s32 64, %v3445_v1  ;;  %v3018_v14 = vld [vmem:[#allocation6] sm:$0xff]   ;;  %p3147_p3 = pneg %p3146_p1  ;;  %s3224_s13 = smov [#allocation9]  }
  0x72   : > { %vm3468_vm1 = vcmp.eq.s32.totalorder %v305_v8, 0  ;;  %vm3477_vm2 = vcmp.eq.s32.totalorder %v312_v9, 0  ;;  %vm3483_vm3 = vcmp.eq.s32.totalorder %v319_v11, 0  ;;  %v607_v23 = vsel %vm591_vm4, 65537, %v3223_v22  ;;  %v530_v13 = vld [vmem:[%s3435_s6 + $0x60] sm:$0xff]  ;;  %s3148_s17 = sshll.u32 %s3224_s13, 4  ;;  %s3149_s17 = int_to_ptr.vmem [resolvable:$false] %s3148_s17 }
  0x73   : > { %vm592_vm5 = vmpackc.low %vm3468_vm1, %vm3468_vm1  ;;  %v347_v35 = vand.u32 7, %v3509_v26  ;;  %v3525_v36 = vadd.s32 72, %v3445_v1  ;;  %vm3529_vm8 = vcmp.eq.s32.totalorder %v326_v28, 0  ;;  %v3534_v40 = vadd.s32 80, %v3445_v1  ;;  %s3150_s7 = scalar_lea.vmem %s3149_s17, 4096  ;;  %p3151_p7 = scmp.lt.s32.totalorder %s4333_s30, %s3149_s17 }
  0x74   : > { %vm593_vm6 = vmpackc.low %vm3477_vm2, %vm3477_vm2  ;;  %v608_v25 = vsel %vm592_vm5, 65537, %v3223_v22  ;;  %2685 = vmatpush3.bf16.msra.mxu0 %v3012_v10  ;;  %vm3538_vm9 = vcmp.eq.s32.totalorder %v333_v32, 0  ;;  %vm3544_vm10 = vcmp.eq.s32.totalorder %v340_v33, 0  ;;  %v354_v44 = vand.u32 7, %v3521_v34  ;;  %v521_v10 = vld [vmem:[%s3435_s6 + $0x18] sm:$0xff]  ;;  %p3152_p9 = scmp.lt.s32.totalorder %s3150_s7, %s3144_s12 }
  0x75   : > { %vm594_vm7 = vmpackc.low %vm3483_vm3, %vm3483_vm3  ;;  %v2511_v27 = vcombine.low %v607_v23, %v608_v25  ;;  %2686 = vmatprep.subr.bf16.mxu0 %v3013_v15  ;;  %v609_v30 = vsel %vm593_vm6, 65537, %v3223_v22  ;;  %v3550_v45 = vadd.s32 88, %v3445_v1  ;;  %vm3557_vm12 = vcmp.eq.s32.totalorder %v347_v35, 0 }
  0x76   : > { %v610_v31 = vsel %vm594_vm7, 65537, %v3223_v22  ;;  %vm595_vm11 = vmpackc.low %vm3529_vm8, %vm3529_vm8  ;;  %v361_v47 = vand.u32 7, %v3525_v36  ;;  %v368_v51 = vand.u32 7, %v3534_v40  ;;  %vm3577_vm0 = vcmp.eq.s32.totalorder %v354_v44, 0  ;;  %v3025_v36 = vld [vmem:[#allocation6 + $0x38] sm:$0xff]   ;;  %p3153_p12 = por %p3152_p9, %p3151_p7 }
  0x77   : > { %v3527_v37 = vcombine.low %v609_v30, %v610_v31  ;;  %v649_v38 = vshll.u32 %v2511_v27, 16  ;;  %v652_v49 = vshrl.u32 %v2511_v27, 16  ;;  %vm596_vm13 = vmpackc.low %vm3538_vm9, %vm3538_vm9  ;;  %v375_v54 = vand.u32 7, %v3550_v45 }
  0x78   : > { %2687 = vmatpush3.bf16.msra.mxu0 %v3013_v15  ;;  %vm597_vm14 = vmpackc.low %vm3544_vm10, %vm3544_vm10  ;;  %v611_v55 = vsel %vm595_vm11, 65537, %v3223_v22  ;;  %v612_v56 = vsel %vm596_vm13, 65537, %v3223_v22  ;;  %vm3586_vm1 = vcmp.eq.s32.totalorder %v361_v47, 0  ;;  %vm3593_vm2 = vcmp.eq.s32.totalorder %v368_v51, 0  ;;  %p3154_p2 = pnand %p3153_p12, %p3147_p3 }
  0x79   : > { %2688 = vmatprep.subr.bf16.mxu0 %v3014_v29  ;;  %v3562_v48 = vrot.slane %v649_v38, 1  ;;  %v656_v50 = vshll.u32 %v3527_v37, 16  ;;  %vm598_vm15 = vmpackc.low %vm3557_vm12, %vm3557_vm12  ;;  %vm647_vm3 = vsmask.f32 7424  ;;  %v613_v62 = vsel %vm597_vm14, 65537, %v3223_v22 }
  0x7a   : > { %v614_v63 = vsel %vm598_vm15, 65537, %v3223_v22  ;;  %vm599_vm4 = vmpackc.low %vm3577_vm0, %vm3577_vm0  ;;  %v2513_v4 = vcombine.low %v611_v55, %v612_v56  ;;  %vm3608_vm6 = vcmp.eq.s32.totalorder %v375_v54, 0  ;;  %vm3619_vm8 = vcmp.eq.s32.totalorder %v326_v28, 7 }
  0x7b   : > { %v654_v58 = vor.u32 %v652_v49, %v3562_v48  ;;  %v658_v59 = vrot.slane %v656_v50, 1  ;;  %vm600_vm5 = vmpackc.low %vm3586_vm1, %vm3586_vm1  ;;  %v3623_v15 = vcombine.low %v613_v62, %v614_v63  ;;  %v615_v18 = vsel %vm599_vm4, 65537, %v3223_v22  ;;  %v3020_v63 = vld [vmem:[#allocation6 + $0x10] sm:$0xff]  }
  0x7c   : > { %2689 = vmatpush3.bf16.msra.mxu0 %v3014_v29  ;;  %vm601_vm7 = vmpackc.low %vm3593_vm2, %vm3593_vm2  ;;  %v616_v19 = vsel %vm600_vm5, 65537, %v3223_v22  ;;  %v3637_v23 = vpack.c.bf16 %v521_v10, %v520_v0  ;;  %v660_v25 = vshrl.u32 %v3527_v37, 16  ;;  %v664_v27 = vshll.u32 %v2513_v4, 16 }
  0x7d   : > { %2690 = vmatprep.subr.bf16.mxu0 %v3015_v41  ;;  %v3617_v12 = vsel %vm647_vm3, %v654_v58, %v658_v59  ;;  %vm602_vm9 = vmpackc.low %vm3608_vm6, %vm3608_vm6  ;;  %v3641_v28 = vadd.s32 96, %v3445_v1  ;;  %v617_v29 = vsel %vm601_vm7, 65537, %v3223_v22  ;;  %v3652_v31 = vadd.s32 104, %v3445_v1 }
  0x7e   : > { %vm4394_vm10 = vcmp.ne.s16.totalorder %v3617_v12, 0  ;;  %v618_v30 = vsel %vm602_vm9, 65537, %v3223_v22  ;;  %v3654_v37 = vpack.c.bf16 %v523_v17, %v522_v16  ;;  %v672_v38 = vshll.u32 %v3623_v15, 16  ;;  %vm1174_vm2 = vmpackc.low %vm3619_vm8, %vm3619_vm8 }
  0x7f   : > { %v3657_v39 = vcombine.low %v615_v18, %v616_v19  ;;  %v668_v43 = vshrl.u32 %v2513_v4, 16  ;;  %v389_v49 = vand.u32 7, %v3652_v31  ;;  %vm3664_vm11 = vcmp.eq.s32.totalorder %v333_v32, 7 }
  0x80   : > { %2691 = vmatpush3.bf16.msra.mxu0 %v3015_v41  ;;  %v382_v41 = vand.u32 7, %v3641_v28  ;;  %v3670_v55 = vcombine.low %v617_v29, %v618_v30  ;;  %vm3680_vm13 = vcmp.eq.s32.totalorder %v312_v9, 7  ;;  %v3687_v20 = vsel %vm4394_vm10, 0, %v3495_v21  ;;  %vm1175_vm4 = vmpackc.low %vm3664_vm11, %vm3664_vm11  ;;  %v3026_v28 = vld [vmem:[#allocation6 + $0x80] sm:$0xff]  }
  0x81   : > { %2692 = vmatprep.subr.bf16.mxu0 %v3016_v52  ;;  %v662_v32 = vor.u32 %v660_v25, %v658_v59  ;;  %v666_v58 = vrot.slane %v664_v27, 1  ;;  %vm499_vm14 = vcmp.eq.s32.totalorder %v389_v49, 0  ;;  %v674_v3 = vrot.slane %v672_v38, 1  ;;  %v3021_v27 = vld [vmem:[#allocation6 + $0x18] sm:$0xff]   ;;  %vm1172_vm8 = vmpackc.low %vm3680_vm13, %vm3680_vm13 }
  0x82   : > { %vm3674_vm12 = vcmp.eq.s32.totalorder %v382_v41, 0  ;;  %v676_v9 = vshrl.u32 %v3623_v15, 16  ;;  %vm604_vm0 = vmpackc.low %vm499_vm14, %vm499_vm14  ;;  %v3700_v59 = vadd.s32 112, %v3445_v1  ;;  %v3705_v6 = vadd.s32 120, %v3445_v1 }
  0x83   : > { %vm603_vm15 = vmpackc.low %vm3674_vm12, %vm3674_vm12  ;;  %v670_v62 = vor.u32 %v668_v43, %v666_v58  ;;  %v620_v4 = vsel %vm604_vm0, 65537, %v3223_v22  ;;  %vm3709_vm1 = vcmp.eq.s32.totalorder %v319_v11, 7  ;;  %v688_v15 = vshll.u32 %v3670_v55, 16  ;;  %v550_v43 = vld [vmem:[#allocation2] sm:$0x80] }
  0x84   : > { %2693 = vmatpush3.bf16.msra.mxu0 %v3016_v52  ;;  %v525_v52 = vld [vmem:[%s3435_s6 + $0x38] sm:$0xff]  ;;  %v619_v0 = vsel %vm603_vm15, 65537, %v3223_v22  ;;  %v396_v16 = vand.u32 7, %v3700_v59  ;;  %v913_v17 = vshrl.u32 %v3687_v20, 16  ;;  %v3719_v18 = vsel %vm647_vm3, %v662_v32, %v666_v58 }
  0x85   : > { %2694 = vmatprep.subr.bf16.mxu0 %v3017_v61  ;;  %v3724_v5 = vpack.c.bf16 %v527_v60, %v526_v53  ;;  %v403_v11 = vand.u32 7, %v3705_v6  ;;  %v678_v19 = vor.u32 %v676_v9, %v674_v3  ;;  %v3730_v29 = vcombine.low %v619_v0, %v620_v4  ;;  %v3028_v6 = vld [vmem:[#allocation6 + $0x90] sm:$0xff]  }
  0x86   : > { %vm500_vm5 = vcmp.eq.s32.totalorder %v396_v16, 0  ;;  %v3735_v30 = vsel %vm647_vm3, %v670_v62, %v674_v3  ;;  %v684_v38 = vshrl.u32 %v3657_v39, 16  ;;  %vm4395_vm9 = vcmp.ne.s16.totalorder %v3719_v18, 0  ;;  %v531_v62 = vld [vmem:[%s3435_s6 + $0x68] sm:$0xff] }
  0x87   : > { %vm501_vm6 = vcmp.eq.s32.totalorder %v403_v11, 0  ;;  %vm605_vm7 = vmpackc.low %vm500_vm5, %vm500_vm5  ;;  %v692_v53 = vshrl.u32 %v3670_v55, 16  ;;  %vm711_vm14 = vcmp.ne.s16.totalorder %v3562_v48, 0  ;;  %vm4389_vm15 = vcmp.ne.s16.totalorder %v3735_v30, 0 }
  0x88   : > { %2695 = vmatpush3.bf16.msra.mxu0 %v3017_v61  ;;  %v680_v61 = vshll.u32 %v3657_v39, 16  ;;  %vm606_vm12 = vmpackc.low %vm501_vm6, %vm501_vm6  ;;  %v621_v56 = vsel %vm605_vm7, 65537, %v3223_v22  ;;  %v3022_v39 = vld [vmem:[#allocation6 + $0x20] sm:$0xff]   ;;  %v696_v55 = vshll.u32 %v3730_v29, 16  ;;  %v3760_v60 = vsel %vm1174_vm2, 65537, %v3223_v22 }
  0x89   : > { %2712 = vmatprep.subr.bf16.mxu0 %v3018_v14  ;;  %v622_v32 = vsel %vm606_vm12, 65537, %v3223_v22  ;;  %v3768_v3 = vsel %vm1175_vm4, 65537, %v3223_v22  ;;  %vm3772_vm0 = vcmp.eq.s32.totalorder %v340_v33, 7  ;;  %v3780_v0 = vrot.slane %v913_v17, 7  ;;  %vm1173_vm5 = vmpackc.low %vm3709_vm1, %vm3709_vm1 }
  0x8a   : > { %v682_v25 = vrot.slane %v680_v61, 1  ;;  %v916_v4 = vshll.u32 %v3687_v20, 16  ;;  %v3789_v24 = vsel %vm4395_vm9, 0, %v3637_v23  ;;  %v720_v33 = vsel %vm711_vm14, 0, %v550_v43 }
  0x8b   : > { %2697 = vmatmul.mubr.bf16.vlgmr.msra.gmra.mrb[0].mxu0 %v3637_v23  ;;  %vm907_vm11 = vsmask.f32 256  ;;  %vm3795_vm2 = vcmp.eq.s32.totalorder %v347_v35, 7  ;;  %v3802_v20 = vsel %vm4389_vm15, 0, %v3654_v37  ;;  %v698_v26 = vrot.slane %v696_v55, 1 }
  0x8c   : > { %2713 = vmatpush3.bf16.msra.mxu0 %v3018_v14  ;;  %2700 = vmatprep.mubr.bf16.mxu0 %v3654_v37  ;;  %v3713_v14 = vpack.c.bf16 %v525_v52, %v524_v46  ;;  %v528_v46 = vld [vmem:[%s3435_s6 + $0x50] sm:$0xff]  ;;  %v529_v52 = vld [vmem:[%s3435_s6 + $0x58] sm:$0xff]  ;;  %v3750_v58 = vsel %vm647_vm3, %v678_v19, %v682_v25  ;;  %v686_v61 = vor.u32 %v684_v38, %v682_v25  ;;  %v3034_v19 = vld [vmem:[#allocation8 + $0x40] sm:$0xff]   ;;  %vm3814_vm6 = vcmp.eq.s32.totalorder %v298_v7, 7 }
  0x8d   : > { %2714 = vmatprep.subr.bf16.mxu0 %v3019_v42  ;;  %vm4390_vm4 = vcmp.ne.s16.totalorder %v3750_v58, 0  ;;  %v3035_v25 = vld [vmem:[#allocation8 + $0x48] sm:$0xff]   ;;  %v3810_v35 = vpack.c.bf16 %v531_v62, %v530_v13  ;;  %vm3820_vm7 = vcmp.eq.s32.totalorder %v305_v8, 7  ;;  %v909_v1 = vshrl.u32 %v720_v33, 16  ;;  %vm1170_vm12 = vmpackc.low %vm3814_vm6, %vm3814_vm6  ;;  %2776 = vmatprep.subr.bf16.mxu1 %v3034_v19  ;;  %v532_v8 = vld [vmem:[%s3435_s6 + $0x70] sm:$0xff] }
  0x8e   : > { %v921_v2 = vshrl.u32 %v3789_v24, 16  ;;  %v929_v7 = vshrl.u32 %v3802_v20, 16  ;;  %vm1171_vm15 = vmpackc.low %vm3820_vm7, %vm3820_vm7  ;;  %2777 = vmatpush3.bf16.msra.mxu1 %v3034_v19  ;;  %vm3858_vm7 = vcmp.eq.s32.totalorder %v354_v44, 7  ;;  %v1186_v34 = vsel %vm1170_vm12, 65537, %v3223_v22  ;;  %v3024_v62 = vld [vmem:[#allocation6 + $0x30] sm:$0xff]  }
  0x8f   : > { %2778 = vmatprep.subr.bf16.mxu1 %v3035_v25  ;;  %v1187_v44 = vsel %vm1171_vm15, 65537, %v3223_v22  ;;  %v911_v33 = vrot.slane %v909_v1, 7  ;;  %vm3879_vm13 = vcmp.eq.s32.totalorder %v361_v47, 7  ;;  %vm3885_vm1 = vcmp.eq.s32.totalorder %v368_v51, 7 }
  0x90   : > { %2715 = vmatpush3.bf16.msra.mxu0 %v3019_v42  ;;  %v690_v42 = vrot.slane %v688_v15, 1  ;;  %v3805_v15 = vpack.c.bf16 %v529_v52, %v528_v46  ;;  %v700_v52 = vshrl.u32 %v3730_v29, 16  ;;  %v3841_v29 = vsel %vm4390_vm4, 0, %v3713_v14 }
  0x91   : > { %2716 = vmatprep.subr.bf16.mxu0 %v3020_v63  ;;  %v3891_v43 = vrot.slane %v921_v2, 7  ;;  %v3896_v47 = vcombine.low %v1186_v34, %v1187_v44  ;;  %v932_v40 = vshll.u32 %v3802_v20, 16  ;;  %v937_v51 = vshrl.u32 %v3841_v29, 16 }
  0x92   : > { %v694_v17 = vor.u32 %v692_v53, %v690_v42  ;;  %v3825_v46 = vsel %vm647_vm3, %v686_v61, %v690_v42  ;;  %v1188_v42 = vsel %vm1172_vm8, 65537, %v3223_v22  ;;  %v533_v61 = vld [vmem:[%s3435_s6 + $0x78] sm:$0xff]  ;;  %v702_v10 = vor.u32 %v700_v52, %v698_v26  ;;  %2779 = vmatpush3.bf16.msra.mxu1 %v3035_v25  ;;  %vm1176_vm8 = vmpackc.low %vm3772_vm0, %vm3772_vm0 }
  0x93   : > { %2701 = vmatmul.mubr.bf16.gmra.mrb[4].mxu0 %v3713_v14  ;;  %vm4391_vm4 = vcmp.ne.s16.totalorder %v3825_v46, 0  ;;  %v3898_v52 = vrot.slane %v929_v7, 7  ;;  %v3926_v7 = vcombine.low %v3760_v60, %v3768_v3  ;;  %vm3930_vm6 = vcmp.eq.s32.totalorder %v375_v54, 7  ;;  %vm1178_vm0 = vmpackc.low %vm3858_vm7, %vm3858_vm7 }
  0x94   : > { %2717 = vmatpush3.bf16.msra.mxu0 %v3020_v63  ;;  %2704 = vmatprep.mubr.bf16.mxu0 %v3724_v5  ;;  %v3778_v63 = vcombine.low %v621_v56, %v622_v32  ;;  %v1189_v56 = vsel %vm1173_vm5, 65537, %v3223_v22  ;;  %v3036_v32 = vld [vmem:[#allocation8 + $0x50] sm:$0xff]   ;;  %v3864_v57 = vsel %vm647_vm3, %v694_v17, %v698_v26  ;;  %v918_v17 = vor.u32 %v916_v4, %v3780_v0  ;;  %vm1177_vm5 = vmpackc.low %vm3795_vm2, %vm3795_vm2 }
  0x95   : > { %2718 = vmatprep.subr.bf16.mxu0 %v3021_v27  ;;  %v3889_v26 = vcombine.low %v1188_v42, %v1189_v56  ;;  %vm4392_vm15 = vcmp.ne.s16.totalorder %v3864_v57, 0  ;;  %v3894_v4 = vpack.c.bf16 %v533_v61, %v532_v8  ;;  %2780 = vmatprep.subr.bf16.mxu1 %v3036_v32  ;;  %v3908_v25 = vsel %vm4391_vm4, 0, %v3724_v5  ;;  %vm1179_vm2 = vmpackc.low %vm3879_vm13, %vm3879_vm13 }
  0x96   : > { %v704_v53 = vshll.u32 %v3778_v63, 16  ;;  %v919_v1 = vsel %vm907_vm11, %v911_v33, %v918_v17  ;;  %v3920_v20 = vsel %vm4392_vm15, 0, %v3805_v15  ;;  %2781 = vmatpush3.bf16.msra.mxu1 %v3036_v32  ;;  %v1227_v42 = vshrl.u32 %v3896_v47, 16  ;;  %vm1181_vm10 = vmpackc.low %vm3930_vm6, %vm3930_vm6 }
  0x97   : > { %v1234_v2 = vshrl.u32 %v3889_v26, 16  ;;  %v940_v56 = vshll.u32 %v3841_v29, 16  ;;  %v945_v32 = vshrl.u32 %v3908_v25, 16  ;;  %vm3940_vm12 = vcmp.eq.s32.totalorder %v382_v41, 7 }
  0x98   : > { %2719 = vmatpush3.bf16.msra.mxu0 %v3021_v27  ;;  %v3023_v27 = vld [vmem:[#allocation6 + $0x28] sm:$0xff]   ;;  %v706_v13 = vrot.slane %v704_v53, 1  ;;  %v708_v45 = vshrl.u32 %v3778_v63, 16  ;;  %vm3948_vm15 = vcmp.eq.s32.totalorder %v389_v49, 7  ;;  %v953_v3 = vshrl.u32 %v3920_v20, 16  ;;  %vm1182_vm7 = vmpackc.low %vm3940_vm12, %vm3940_vm12 }
  0x99   : > { %2720 = vmatprep.subr.bf16.mxu0 %v3022_v39  ;;  %v934_v41 = vor.u32 %v932_v40, %v3898_v52  ;;  %v1192_v63 = vsel %vm1176_vm8, 65537, %v3223_v22  ;;  %v1193_v31 = vsel %vm1177_vm5, 65537, %v3223_v22  ;;  %v939_v49 = vrot.slane %v937_v51, 7  ;;  %vm1180_vm5 = vmpackc.low %vm3885_vm1, %vm3885_vm1 }
  0x9a   : > { %v3911_v53 = vsel %vm647_vm3, %v702_v10, %v706_v13  ;;  %v948_v29 = vshll.u32 %v3908_v25, 16  ;;  %v3967_v61 = vrot.slane %v1234_v2, 7  ;;  %v1237_v34 = vshll.u32 %v3889_v26, 16  ;;  %vm1183_vm13 = vmpackc.low %vm3948_vm15, %vm3948_vm15 }
  0x9b   : > { %2705 = vmatmul.mubr.bf16.gmra.mrb[8].mxu0 %v3805_v15  ;;  %vm4393_vm4 = vcmp.ne.s16.totalorder %v3911_v53, 0  ;;  %vm3975_vm8 = vcmp.eq.s32.totalorder %v396_v16, 7  ;;  %v1229_v44 = vrot.slane %v1227_v42, 7  ;;  %v1230_v10 = vshll.u32 %v3896_v47, 16 }
  0x9c   : > { %2721 = vmatpush3.bf16.msra.mxu0 %v3022_v39  ;;  %2708 = vmatprep.mubr.bf16.mxu0 %v3810_v35  ;;  %v924_v39 = vshll.u32 %v3789_v24, 16  ;;  %v3037_v24 = vld [vmem:[#allocation8 + $0x58] sm:$0xff]   ;;  %v727_v50 = vsel %vm4393_vm4, 0, %v3810_v35  ;;  %v3988_v33 = vor.u32 %v708_v45, %v706_v13  ;;  %v2538_v16 = vcombine.low %v1192_v63, %v1193_v31  ;;  %v3027_v13 = vld [vmem:[#allocation6 + $0x88] sm:$0xff]   ;;  %vm1184_vm1 = vmpackc.low %vm3975_vm8, %vm3975_vm8 }
  0x9d   : > { %2722 = vmatprep.subr.bf16.mxu0 %v3023_v27  ;;  %2782 = vmatprep.subr.bf16.mxu1 %v3037_v24  ;;  %v3995_v17 = vrot.slane %v953_v3, 7  ;;  %vm4000_vm4 = vcmp.eq.s32.totalorder %v403_v11, 7  ;;  %v1239_v47 = vor.u32 %v1237_v34, %v3967_v61  ;;  %v4011_v11 = vor.u32 %v1230_v10, %v1229_v44 }
  0x9e   : > { %2783 = vmatpush3.bf16.msra.mxu1 %v3037_v24  ;;  %v1242_v24 = vshrl.u32 %v3926_v7, 16  ;;  %v1195_v40 = vsel %vm1179_vm2, 65537, %v3223_v22  ;;  %vm719_vm9 = vcmp.ne.s16.totalorder %v3988_v33, 0  ;;  %v942_v51 = vor.u32 %v940_v56, %v939_v49 }
  0x9f   : > { %v1250_v25 = vshrl.u32 %v2538_v16, 16  ;;  %v1196_v55 = vsel %vm1180_vm5, 65537, %v3223_v22  ;;  %v1197_v19 = vsel %vm1181_vm10, 65537, %v3223_v22  ;;  %v964_v56 = vshll.u32 %v727_v50, 16 }
  0xa0   : > { %2723 = vmatpush3.bf16.msra.mxu0 %v3023_v27  ;;  %v926_v27 = vor.u32 %v924_v39, %v3891_v43  ;;  %v956_v39 = vshll.u32 %v3920_v20, 16  ;;  %v4040_v20 = vsel %vm907_vm11, %v1229_v44, %v1239_v47  ;;  %v1244_v2 = vrot.slane %v1242_v24, 7  ;;  %v3030_v44 = vld [vmem:[#allocation6 + $0xa0] sm:$0xff]  }
  0xa1   : > { %2724 = vmatprep.subr.bf16.mxu0 %v3024_v62  ;;  %v728_v8 = vsel %vm719_vm9, 0, %v3894_v4  ;;  %vm1289_vm10 = vcmp.ne.s16.totalorder %v4011_v11, 0  ;;  %v1252_v45 = vrot.slane %v1250_v25, 7  ;;  %v1253_v3 = vshll.u32 %v2538_v16, 16 }
  0xa2   : > { %v927_v59 = vsel %vm907_vm11, %v3780_v0, %v926_v27  ;;  %v935_v0 = vsel %vm907_vm11, %v3891_v43, %v934_v41  ;;  %v1194_v43 = vsel %vm1178_vm0, 65537, %v3223_v22  ;;  %v1245_v27 = vshll.u32 %v3926_v7, 16  ;;  %vm1185_vm0 = vmpackc.low %vm4000_vm4, %vm4000_vm4 }
  0xa3   : > { %2709 = vmatmul.mubr.bf16.gmra.mrb[12].mxu0 %v3894_v4  ;;  %v2539_v42 = vcombine.low %v1194_v43, %v1195_v40  ;;  %v943_v7 = vsel %vm907_vm11, %v3898_v52, %v942_v51  ;;  %vm1290_vm6 = vcmp.ne.s16.totalorder %v4040_v20, 0  ;;  %v958_v63 = vor.u32 %v956_v39, %v3995_v17 }
  0xa4   : > { %2725 = vmatpush3.bf16.msra.mxu0 %v3024_v62  ;;  %2728 = vmatprep.mubr.bf16.mxu0 %v919_v1  ;;  %v3986_v62 = vrot.slane %v945_v32, 7  ;;  %v3029_v32 = vld [vmem:[#allocation6 + $0x98] sm:$0xff]   ;;  %v1298_v52 = vsel %vm1289_vm10, 0, %v3495_v21  ;;  %v1247_v31 = vor.u32 %v1245_v27, %v1244_v2  ;;  %v969_v34 = vshrl.u32 %v728_v8, 16 }
  0xa5   : > { %2726 = vmatprep.subr.bf16.mxu0 %v3025_v36  ;;  %v1199_v21 = vsel %vm1183_vm13, 65537, %v3223_v22  ;;  %v1255_v10 = vor.u32 %v1253_v3, %v1252_v45  ;;  %v1299_v16 = vsel %vm1290_vm6, 0, %v3637_v23  ;;  %v1327_v60 = vshll.u32 %v1298_v52, 16 }
  0xa6   : > { %v950_v1 = vor.u32 %v948_v29, %v3986_v62  ;;  %v1258_v29 = vshrl.u32 %v2539_v42, 16  ;;  %v1200_v54 = vsel %vm1184_vm1, 65537, %v3223_v22  ;;  %v1201_v39 = vsel %vm1185_vm0, 65537, %v3223_v22 }
  0xa7   : > { %v971_v47 = vrot.slane %v969_v34, 7  ;;  %v972_v24 = vshll.u32 %v728_v8, 16  ;;  %v959_v9 = vsel %vm907_vm11, %v3986_v62, %v958_v63  ;;  %v4106_v26 = vsel %vm907_vm11, %v1244_v2, %v1255_v10  ;;  %v3033_v34 = vld [vmem:[#allocation6 + $0xb8] sm:$0xff]  }
  0xa8   : > { %2727 = vmatpush3.bf16.msra.mxu0 %v3025_v36  ;;  %v961_v36 = vshrl.u32 %v727_v50, 16  ;;  %v951_v41 = vsel %vm907_vm11, %v939_v49, %v950_v1  ;;  %v1198_v49 = vsel %vm1182_vm7, 65537, %v3223_v22  ;;  %v1260_v23 = vrot.slane %v1258_v29, 7 }
  0xa9   : > { %2744 = vmatprep.subr.bf16.mxu0 %v3026_v28  ;;  %v2542_v40 = vcombine.low %v1200_v54, %v1201_v39  ;;  %v1325_v51 = vshrl.u32 %v1298_v52, 16  ;;  %v1329_v25 = vrot.slane %v1327_v60, 1  ;;  %v1332_v1 = vshll.u32 %v1299_v16, 16 }
  0xaa   : > { %v4046_v38 = vrot.slane %v961_v36, 7  ;;  %v2541_v36 = vcombine.low %v1198_v49, %v1199_v21  ;;  %v974_v62 = vor.u32 %v972_v24, %v971_v47  ;;  %vm1292_vm15 = vcmp.ne.s16.totalorder %v4106_v26, 0  ;;  %v3047_v26 = vld [vmem:[#allocation8 + $0x28] sm:$0xff]  }
  0xab   : > { %2729 = vmatmul.mubr.bf16.vlgmr.msra.gmra.mrb[0].mxu0 %v927_v59  ;;  %v1282_v27 = vshrl.u32 %v2542_v40, 16  ;;  %v1334_v8 = vrot.slane %v1332_v1, 1  ;;  %v1285_v29 = vshll.u32 %v2542_v40, 16  ;;  %vm4464_vm13 = vcmp.ne.s16.totalorder %v3719_v18, 0 }
  0xac   : > { %2745 = vmatpush3.bf16.msra.mxu0 %v3026_v28  ;;  %2732 = vmatprep.mubr.bf16.mxu0 %v935_v0  ;;  %v2540_v28 = vcombine.low %v1196_v55, %v1197_v19  ;;  %v966_v50 = vor.u32 %v964_v56, %v4046_v38  ;;  %v1261_v0 = vshll.u32 %v2539_v42, 16  ;;  %v1274_v19 = vshrl.u32 %v2541_v36, 16  ;;  %v3032_v42 = vld [vmem:[#allocation6 + $0xb0] sm:$0xff]  }
  0xad   : > { %2746 = vmatprep.subr.bf16.mxu0 %v3027_v13  ;;  %v1330_v56 = vor.u32 %v1329_v25, %v1325_v51  ;;  %vm4465_vm1 = vcmp.ne.s16.totalorder %v3617_v12, 0  ;;  %vm4469_vm0 = vcmp.ne.s16.totalorder %v3825_v46, 0 }
  0xae   : > { %v1266_v59 = vshrl.u32 %v2540_v28, 16  ;;  %v1269_v43 = vshll.u32 %v2540_v28, 16  ;;  %v1263_v55 = vor.u32 %v1261_v0, %v1260_v23  ;;  %v1276_v3 = vrot.slane %v1274_v19, 7 }
  0xaf   : > { %v1277_v28 = vshll.u32 %v2541_v36, 16 }
  0xb0   : > { %2747 = vmatpush3.bf16.msra.mxu0 %v3027_v13  ;;  %v4099_v13 = vsel %vm907_vm11, %v3967_v61, %v1247_v31  ;;  %v1268_v22 = vrot.slane %v1266_v59, 7  ;;  %v3031_v61 = vld [vmem:[#allocation6 + $0xa8] sm:$0xff]   ;;  %v4124_v31 = vrot.slane %v1282_v27, 7 }
  0xb1   : > { %2748 = vmatprep.subr.bf16.mxu0 %v3028_v6  ;;  %vm1291_vm4 = vcmp.ne.s16.totalorder %v4099_v13, 0  ;;  %v1279_v49 = vor.u32 %v1277_v28, %v1276_v3 }
  0xb2   : > { %v1271_v2 = vor.u32 %v1269_v43, %v1268_v22  ;;  %v1287_v10 = vor.u32 %v1285_v29, %v4124_v31  ;;  %vm1297_vm7 = vcmp.ne.s16.totalorder %v4124_v31, 0  ;;  %v3040_v29 = vld [vmem:[#allocation8 + $0x70] sm:$0xff]  }
  0xb3   : > { %2733 = vmatmul.mubr.bf16.gmra.mrb[4].mxu0 %v943_v7  ;;  %v4117_v7 = vsel %vm907_vm11, %v1252_v45, %v1263_v55  ;;  %v4137_v54 = vsel %vm907_vm11, %v1268_v22, %v1279_v49 }
  0xb4   : > { %2749 = vmatpush3.bf16.msra.mxu0 %v3028_v6  ;;  %2736 = vmatprep.mubr.bf16.mxu0 %v951_v41  ;;  %v967_v6 = vsel %vm907_vm11, %v3995_v17, %v966_v50  ;;  %v1300_v17 = vsel %vm1291_vm4, 0, %v3654_v37  ;;  %v975_v41 = vsel %vm907_vm11, %v4046_v38, %v974_v62  ;;  %v1336_v37 = vshrl.u32 %v1299_v16, 16  ;;  %v1137_v62 = vld [vmem:[#allocation2 + $0x48] sm:$0x1] }
  0xb5   : > { %2750 = vmatprep.subr.bf16.mxu0 %v3029_v32  ;;  %v1340_v63 = vshll.u32 %v1300_v17, 16  ;;  %v4122_v52 = vsel %vm907_vm11, %v1260_v23, %v1271_v2  ;;  %v1344_v45 = vshrl.u32 %v1300_v17, 16  ;;  %vm1293_vm12 = vcmp.ne.s16.totalorder %v4117_v7, 0 }
  0xb6   : > { %vm1294_vm8 = vcmp.ne.s16.totalorder %v4122_v52, 0  ;;  %v1338_v21 = vor.u32 %v1336_v37, %v1334_v8  ;;  %v4141_v36 = vsel %vm907_vm11, %v1276_v3, %v1287_v10  ;;  %vm1295_vm2 = vcmp.ne.s16.totalorder %v4137_v54, 0  ;;  %v3039_v37 = vld [vmem:[#allocation8 + $0x68] sm:$0xff]  }
  0xb7   : > { %v1342_v38 = vrot.slane %v1340_v63, 1  ;;  %v1303_v60 = vsel %vm1294_vm8, 0, %v3805_v15  ;;  %vm1296_vm5 = vcmp.ne.s16.totalorder %v4141_v36, 0  ;;  %v3038_v63 = vld [vmem:[#allocation8 + $0x60] sm:$0xff]  }
  0xb8   : > { %2751 = vmatpush3.bf16.msra.mxu0 %v3029_v32  ;;  %v1301_v32 = vsel %vm1292_vm15, 0, %v3713_v14  ;;  %v1335_v14 = vsel %vm647_vm3, %v1330_v56, %v1334_v8  ;;  %v1364_v24 = vshll.u32 %v1303_v60, 16  ;;  %v1305_v40 = vsel %vm1296_vm5, 0, %v3894_v4  ;;  %2784 = vmatprep.subr.bf16.mxu1 %v3038_v63 }
  0xb9   : > { %2752 = vmatprep.subr.bf16.mxu0 %v3030_v44  ;;  %v1348_v50 = vshll.u32 %v1301_v32, 16  ;;  %v1346_v59 = vor.u32 %v1344_v45, %v1342_v38  ;;  %v1343_v23 = vsel %vm647_vm3, %v1338_v21, %v1342_v38  ;;  %v1352_v0 = vshrl.u32 %v1301_v32, 16  ;;  %2785 = vmatpush3.bf16.msra.mxu1 %v3038_v63  ;;  %v4163_v45 = vld [vmem:[%s4382_s2] ss:$0 sm:$0xff] }
  0xba   : > { %v1366_v43 = vrot.slane %v1364_v24, 1  ;;  %v1368_v25 = vshrl.u32 %v1303_v60, 16  ;;  %v1380_v19 = vshll.u32 %v1305_v40, 16  ;;  %v1306_v4 = vsel %vm1297_vm7, 0, %v1137_v62  ;;  %2786 = vmatprep.subr.bf16.mxu1 %v3039_v37 }
  0xbb   : > { %2737 = vmatmul.mubr.bf16.gmra.mrb[8].mxu0 %v959_v9  ;;  %v1350_v16 = vrot.slane %v1348_v50, 1  ;;  %v1384_v56 = vshrl.u32 %v1305_v40, 16  ;;  %v1388_v8 = vshll.u32 %v1306_v4, 16  ;;  %v3043_v40 = vld [vmem:[#allocation8 + $0x8] sm:$0xff]  }
  0xbc   : > { %2753 = vmatpush3.bf16.msra.mxu0 %v3030_v44  ;;  %2740 = vmatprep.mubr.bf16.mxu0 %v967_v6  ;;  %v1302_v44 = vsel %vm1293_vm12, 0, %v3724_v5  ;;  %v1304_v6 = vsel %vm1295_vm2, 0, %v3810_v35  ;;  %v1370_v35 = vor.u32 %v1368_v25, %v1366_v43  ;;  %v1382_v27 = vrot.slane %v1380_v19, 1 }
  0xbd   : > { %2754 = vmatprep.subr.bf16.mxu0 %v3031_v61  ;;  %v1356_v39 = vshll.u32 %v1302_v44, 16  ;;  %v1351_v5 = vsel %vm647_vm3, %v1346_v59, %v1350_v16  ;;  %v1360_v47 = vshrl.u32 %v1302_v44, 16  ;;  %v1354_v15 = vor.u32 %v1352_v0, %v1350_v16  ;;  %2787 = vmatpush3.bf16.msra.mxu1 %v3039_v37 }
  0xbe   : > { %v1376_v55 = vshrl.u32 %v1304_v6, 16  ;;  %v1386_v3 = vor.u32 %v1384_v56, %v1382_v27  ;;  %v1390_v28 = vrot.slane %v1388_v8, 1  ;;  %2788 = vmatprep.subr.bf16.mxu1 %v3040_v29  ;;  %v3044_v56 = vld [vmem:[#allocation8 + $0x10] sm:$0xff]  }
  0xbf   : > { %v1358_v9 = vrot.slane %v1356_v39, 1 }
  0xc0   : > { %2755 = vmatpush3.bf16.msra.mxu0 %v3031_v61  ;;  %v1372_v61 = vshll.u32 %v1304_v6, 16 }
  0xc1   : > { %2756 = vmatprep.subr.bf16.mxu0 %v3032_v42  ;;  %v1362_v22 = vor.u32 %v1360_v47, %v1358_v9  ;;  %v1359_v51 = vsel %vm647_vm3, %v1354_v15, %v1358_v9  ;;  %2789 = vmatpush3.bf16.msra.mxu1 %v3040_v29 }
  0xc2   : > { %v1374_v17 = vrot.slane %v1372_v61, 1 }
  0xc3   : > { %2741 = vmatmul.mubr.bf16.gmra.mrb[12].mxu0 %v975_v41  ;;  %v1367_v1 = vsel %vm647_vm3, %v1362_v22, %v1366_v43  ;;  %v1391_v41 = vsel %vm647_vm3, %v1386_v3, %v1390_v28 }
  0xc4   : > { %2757 = vmatpush3.bf16.msra.mxu0 %v3032_v42  ;;  %2760 = vmatprep.mubr.bf16.mxu0 %v1335_v14  ;;  %v1378_v2 = vor.u32 %v1376_v55, %v1374_v17  ;;  %v1375_v42 = vsel %vm647_vm3, %v1370_v35, %v1374_v17  ;;  %v3042_v14 = vld [vmem:[#allocation8] sm:$0xff]  }
  0xc5   : > { %2758 = vmatprep.subr.bf16.mxu0 %v3033_v34 }
  0xc6   : > { %v1383_v32 = vsel %vm647_vm3, %v1378_v2, %v1382_v27 }
  0xc8   : > { %2759 = vmatpush3.bf16.msra.mxu0 %v3033_v34  ;;  %v3041_v34 = vld [vmem:[#allocation8 + $0x78] sm:$0xff]  }
  0xc9   : > { %2790 = vmatprep.subr.bf16.mxu1 %v3041_v34 }
  0xca   : > { %2791 = vmatpush3.bf16.msra.mxu1 %v3041_v34 }
  0xcb   : > { %2761 = vmatmul.mubr.bf16.vlgmr.msra.gmra.mrb[0].mxu0 %v1343_v23  ;;  %2808 = vmatprep.subr.bf16.mxu1 %v3042_v14  ;;  %v1616_v23 = vld [vmem:[#allocation2] sm:$0x80] }
  0xcc   : > { %2764 = vmatprep.mubr.bf16.mxu0 %v1351_v5  ;;  %v1625_v15 = vsel %vm711_vm14, 0, %v1616_v23  ;;  %vm4466_vm14 = vcmp.ne.s16.totalorder %v3750_v58, 0 }
  0xcd   : > { %v1813_v62 = vshrl.u32 %v1625_v15, 16 }
  0xcf   : > { %v4189_v11 = vrot.slane %v1813_v62, 7 }
  0xd3   : > { %2765 = vmatmul.mubr.bf16.gmra.mrb[4].mxu0 %v1359_v51 }
  0xd4   : > { %2768 = vmatprep.mubr.bf16.mxu0 %v1367_v1 }
  0xdb   : > { %2769 = vmatmul.mubr.bf16.gmra.mrb[8].mxu0 %v1375_v42 }
  0xdc   : > { %2772 = vmatprep.mubr.bf16.mxu0 %v1383_v32 }
  0xe3   : > { %2773 = vmatmul.mubr.bf16.gmra.mrb[12].mxu0 %v1391_v41 }
 0x19e   : > { %v2762_v50 = vpop.f32.mrb[0].mxu0 }
 0x19f   : > { %v1570_v49 = vadd.f32 %v2762_v50, %v4163_v45  ;;  %v1482_v38 = vpop.f32.mrb[1].mxu0 }
 0x1a0   : > { %v1568_v21 = vadd.f32 %v4163_v45, %v1482_v38  ;;  %v2763_v44 = vpop.f32.mrb[2].mxu0 }
 0x1a1   : > { %v1571_v10 = vadd.f32 %v2763_v44, %v4163_v45  ;;  %v1485_v59 = vpop.f32.mrb[3].mxu0  ;;  %v1586_v60 = vmax.f32 %v1570_v49, 0.0 }
 0x1a2   : > { %v1569_v16 = vadd.f32 %v4163_v45, %v1485_v59  ;;  %v1584_v0 = vmax.f32 %v1568_v21, 0.0  ;;  %v3045_v59 = vld [vmem:[#allocation8 + $0x18] sm:$0xff]  }
 0x1a3   : > { %v1587_v39 = vmax.f32 %v1571_v10, 0.0 }
 0x1a4   : > { %v1585_v5 = vmax.f32 %v1569_v16, 0.0 }
 0x1a5   : > { %v1601_v47 = vpack.c.bf16 %v1587_v39, %v1586_v60 }
 0x1a6   : > { %v1600_v24 = vpack.c.bf16 %v1585_v5, %v1584_v0  ;;  %v2766_v9 = vpop.f32.mrb[4].mxu0 }
 0x1a7   : > { %v1574_v6 = vadd.f32 %v2766_v9, %v4163_v45  ;;  %v1498_v22 = vpop.f32.mrb[5].mxu0  ;;  %v1627_v43 = vsel %vm4464_vm13, 0, %v1601_v47  ;;  %v4180_v17 = vsel %vm1290_vm6, 0, %v1601_v47  ;;  %vm4468_vm6 = vcmp.ne.s16.totalorder %v3864_v57, 0 }
 0x1a8   : > { %v1572_v61 = vadd.f32 %v4163_v45, %v1498_v22  ;;  %v2767_v51 = vpop.f32.mrb[6].mxu0  ;;  %v1626_v25 = vsel %vm4465_vm1, 0, %v1600_v24  ;;  %2792 = vmatprep.mubr.bf16.mxu1 %v1600_v24  ;;  %v1825_v1 = vshrl.u32 %v1627_v43, 16  ;;  %v1828_v2 = vshll.u32 %v1627_v43, 16 }
 0x1a9   : > { %v1575_v55 = vadd.f32 %v2767_v51, %v4163_v45  ;;  %v1501_v19 = vpop.f32.mrb[7].mxu0  ;;  %v1817_v48 = vshrl.u32 %v1626_v25, 16  ;;  %2793 = vmatmul.mubr.bf16.vlgmr.msra.gmra.mrb[0].mxu1 %v1601_v47  ;;  %v2042_v12 = vsel %vm1289_vm10, 0, %v1600_v24  ;;  %v1590_v27 = vmax.f32 %v1574_v6, 0.0 }
 0x1aa   : > { %v1573_v18 = vadd.f32 %v4163_v45, %v1501_v19  ;;  %v4183_v35 = vrot.slane %v1825_v1, 7  ;;  %2809 = vmatpush3.bf16.msra.mxu1 %v3042_v14  ;;  %v2071_v8 = vshll.u32 %v2042_v12, 16  ;;  %v1588_v32 = vmax.f32 %v1572_v61, 0.0 }
 0x1ab   : > { %v1591_v4 = vmax.f32 %v1575_v55, 0.0  ;;  %v1819_v42 = vrot.slane %v1817_v48, 7  ;;  %2810 = vmatprep.subr.bf16.mxu1 %v3043_v40  ;;  %v2076_v28 = vshll.u32 %v4180_v17, 16  ;;  %v1820_v63 = vshll.u32 %v1626_v25, 16  ;;  %v3046_v25 = vld [vmem:[#allocation8 + $0x20] sm:$0xff]  }
 0x1ac   : > { %v1589_v3 = vmax.f32 %v1573_v18, 0.0  ;;  %v1830_v20 = vor.u32 %v1828_v2, %v4183_v35  ;;  %v2069_v37 = vshrl.u32 %v2042_v12, 16  ;;  %v2073_v29 = vrot.slane %v2071_v8, 1 }
 0x1ad   : > { %v1603_v41 = vpack.c.bf16 %v1591_v4, %v1590_v27  ;;  %v2080_v49 = vshrl.u32 %v4180_v17, 16  ;;  %v4196_v44 = vor.u32 %v1820_v63, %v1819_v42  ;;  %vm4467_vm10 = vcmp.ne.s16.totalorder %v3735_v30, 0 }
 0x1ae   : > { %v1602_v34 = vpack.c.bf16 %v1589_v3, %v1588_v32  ;;  %v2770_v14 = vpop.f32.mrb[8].mxu0  ;;  %2811 = vmatpush3.bf16.msra.mxu1 %v3043_v40  ;;  %v4192_v50 = vsel %vm907_vm11, %v1819_v42, %v1830_v20  ;;  %v2074_v16 = vor.u32 %v2073_v29, %v2069_v37  ;;  %v2078_v5 = vrot.slane %v2076_v28, 1 }
 0x1af   : > { %v1578_v38 = vadd.f32 %v2770_v14, %v4163_v45  ;;  %v1514_v21 = vpop.f32.mrb[9].mxu0  ;;  %v1629_v10 = vsel %vm4466_vm14, 0, %v1603_v41  ;;  %2812 = vmatprep.subr.bf16.mxu1 %v3044_v56  ;;  %v2045_v62 = vsel %vm1292_vm15, 0, %v1603_v41 }
 0x1b0   : > { %v1576_v60 = vadd.f32 %v4163_v45, %v1514_v21  ;;  %v2771_v39 = vpop.f32.mrb[10].mxu0  ;;  %v1628_v23 = vsel %vm4467_vm10, 0, %v1602_v34  ;;  %2796 = vmatprep.mubr.bf16.mxu1 %v1602_v34  ;;  %v1841_v0 = vshrl.u32 %v1629_v10, 16  ;;  %v1844_v58 = vshll.u32 %v1629_v10, 16 }
 0x1b1   : > { %v1594_v47 = vmax.f32 %v1578_v38, 0.0  ;;  %v1579_v24 = vadd.f32 %v2771_v39, %v4163_v45  ;;  %v1517_v9 = vpop.f32.mrb[11].mxu0  ;;  %v1833_v15 = vshrl.u32 %v1628_v23, 16  ;;  %2797 = vmatmul.mubr.bf16.gmra.mrb[4].mxu1 %v1603_v41  ;;  %v1836_v22 = vshll.u32 %v1628_v23, 16  ;;  %v3048_v39 = vld [vmem:[#allocation8 + $0x30] sm:$0xff]  }
 0x1b2   : > { %v1577_v6 = vadd.f32 %v4163_v45, %v1517_v9  ;;  %v4205_v43 = vrot.slane %v1841_v0, 7  ;;  %2813 = vmatpush3.bf16.msra.mxu1 %v3044_v56  ;;  %v4208_v40 = vsel %vm647_vm3, %v2074_v16, %v2078_v5  ;;  %v1592_v30 = vmax.f32 %v1576_v60, 0.0 }
 0x1b3   : > { %v1595_v61 = vmax.f32 %v1579_v24, 0.0  ;;  %v1835_v51 = vrot.slane %v1833_v15, 7  ;;  %2814 = vmatprep.subr.bf16.mxu1 %v3045_v59  ;;  %v2044_v1 = vsel %vm1291_vm4, 0, %v1602_v34  ;;  %v2082_v2 = vor.u32 %v2080_v49, %v2078_v5 }
 0x1b4   : > { %v1593_v55 = vmax.f32 %v1577_v6, 0.0  ;;  %v1846_v19 = vor.u32 %v1844_v58, %v4205_v43  ;;  %v2084_v48 = vshll.u32 %v2044_v1, 16  ;;  %v2092_v12 = vshll.u32 %v2045_v62, 16 }
 0x1b5   : > { %v1605_v17 = vpack.c.bf16 %v1595_v61, %v1594_v47  ;;  %v1838_v18 = vor.u32 %v1836_v22, %v1835_v51  ;;  %v2088_v13 = vshrl.u32 %v2044_v1, 16  ;;  %v2096_v28 = vshrl.u32 %v2045_v62, 16 }
 0x1b6   : > { %v1604_v27 = vpack.c.bf16 %v1593_v55, %v1592_v30  ;;  %v2774_v4 = vpop.f32.mrb[12].mxu0  ;;  %2815 = vmatpush3.bf16.msra.mxu1 %v3045_v59  ;;  %v4216_v42 = vsel %vm907_vm11, %v1835_v51, %v1846_v19  ;;  %v2086_v56 = vrot.slane %v2084_v48, 1  ;;  %v2094_v34 = vrot.slane %v2092_v12, 1 }
 0x1b7   : > { %v1582_v8 = vadd.f32 %v2774_v4, %v4163_v45  ;;  %v1530_v32 = vpop.f32.mrb[13].mxu0  ;;  %v1631_v3 = vsel %vm4468_vm6, 0, %v1605_v17  ;;  %2816 = vmatprep.subr.bf16.mxu1 %v3046_v25  ;;  %v4223_v20 = vsel %vm907_vm11, %v4183_v35, %v1838_v18  ;;  %v2047_v6 = vsel %vm1294_vm8, 0, %v1605_v17 }
 0x1b8   : > { %v1580_v41 = vadd.f32 %v4163_v45, %v1530_v32  ;;  %v2775_v63 = vpop.f32.mrb[14].mxu0  ;;  %v1630_v37 = vsel %vm4469_vm0, 0, %v1604_v27  ;;  %2800 = vmatprep.mubr.bf16.mxu1 %v1604_v27  ;;  %v1857_v29 = vshrl.u32 %v1631_v3, 16  ;;  %v1860_v21 = vshll.u32 %v1631_v3, 16 }
 0x1b9   : > { %v1598_v14 = vmax.f32 %v1582_v8, 0.0  ;;  %v1583_v57 = vadd.f32 %v2775_v63, %v4163_v45  ;;  %v1533_v49 = vpop.f32.mrb[15].mxu0  ;;  %v1849_v38 = vshrl.u32 %v1630_v37, 16  ;;  %2801 = vmatmul.mubr.bf16.gmra.mrb[8].mxu1 %v1605_v17  ;;  %v1852_v10 = vshll.u32 %v1630_v37, 16  ;;  %v3051_v37 = vld [vmem:[#allocation8 + $0x88] sm:$0xff]  }
 0x1ba   : > { %v1581_v35 = vadd.f32 %v4163_v45, %v1533_v49  ;;  %v1859_v59 = vrot.slane %v1857_v29, 7  ;;  %2817 = vmatpush3.bf16.msra.mxu1 %v3046_v25  ;;  %v4231_v16 = vsel %vm647_vm3, %v2082_v2, %v2086_v56  ;;  %v2090_v23 = vor.u32 %v2088_v13, %v2086_v56  ;;  %v3049_v25 = vld [vmem:[#allocation8 + $0x38] sm:$0xff]   ;;  %v3052_v49 = vld [vmem:[#allocation8 + $0x90] sm:$0xff]  }
 0x1bb   : > { %v1599_v46 = vmax.f32 %v1583_v57, 0.0  ;;  %v1851_v60 = vrot.slane %v1849_v38, 7  ;;  %2818 = vmatprep.subr.bf16.mxu1 %v3047_v26  ;;  %v2046_v0 = vsel %vm1293_vm12, 0, %v1604_v27  ;;  %v1596_v5 = vmax.f32 %v1580_v41, 0.0  ;;  %v3053_v38 = vld [vmem:[#allocation8 + $0x98] sm:$0xff]  }
 0x1bc   : > { %v1597_v47 = vmax.f32 %v1581_v35, 0.0  ;;  %v1862_v24 = vor.u32 %v1860_v21, %v1859_v59  ;;  %v2100_v9 = vshll.u32 %v2046_v0, 16  ;;  %v4236_v58 = vsel %vm647_vm3, %v2090_v23, %v2094_v34  ;;  %v3054_v21 = vld [vmem:[#allocation8 + $0xa0] sm:$0xff]   ;;  %v3055_v35 = vld [vmem:[#allocation8 + $0xa8] sm:$0xff]  }
 0x1bd   : > { %v1607_v15 = vpack.c.bf16 %v1599_v46, %v1598_v14  ;;  %v1854_v45 = vor.u32 %v1852_v10, %v1851_v60  ;;  %v2098_v61 = vor.u32 %v2096_v28, %v2094_v34  ;;  %v2104_v55 = vshrl.u32 %v2046_v0, 16  ;;  %v2330_v0 = vld [vmem:[%s3435_s6 + $0x10] sm:$0xff] }
 0x1be   : > { %v1606_v22 = vpack.c.bf16 %v1597_v47, %v1596_v5  ;;  %2819 = vmatpush3.bf16.msra.mxu1 %v3047_v26  ;;  %v1863_v30 = vsel %vm907_vm11, %v1851_v60, %v1862_v24  ;;  %v2102_v51 = vrot.slane %v2100_v9, 1  ;;  %v2108_v19 = vshll.u32 %v2047_v6, 16  ;;  %v2328_v47 = vld [vmem:[%s3435_s6] sm:$0xff] }
 0x1bf   : > { %v1633_v7 = vsel %vm719_vm9, 0, %v1607_v15  ;;  %2820 = vmatprep.subr.bf16.mxu1 %v3048_v39  ;;  %v1855_v1 = vsel %vm907_vm11, %v4205_v43, %v1854_v45  ;;  %vm4470_vm4 = vcmp.ne.s16.totalorder %v3911_v53, 0  ;;  %v1823_v62 = vsel %vm907_vm11, %v4189_v11, %v4196_v44  ;;  %v3050_v44 = vld [vmem:[#allocation8 + $0x80] sm:$0xff]  }
 0x1c0   : > { %v1632_v52 = vsel %vm4470_vm4, 0, %v1606_v22  ;;  %2804 = vmatprep.mubr.bf16.mxu1 %v1606_v22  ;;  %v1873_v48 = vshrl.u32 %v1633_v7, 16  ;;  %v4251_v17 = vsel %vm647_vm3, %v2098_v61, %v2102_v51  ;;  %v2106_v18 = vor.u32 %v2104_v55, %v2102_v51 }
 0x1c1   : > { %v1865_v33 = vshrl.u32 %v1632_v52, 16  ;;  %2805 = vmatmul.mubr.bf16.gmra.mrb[12].mxu1 %v1607_v15  ;;  %v2110_v2 = vrot.slane %v2108_v19, 1  ;;  %v2112_v12 = vshrl.u32 %v2047_v6, 16  ;;  %v1876_v27 = vshll.u32 %v1633_v7, 16 }
 0x1c2   : > { %v1875_v43 = vrot.slane %v1873_v48, 7  ;;  %2821 = vmatpush3.bf16.msra.mxu1 %v3048_v39  ;;  %2824 = vmatprep.mubr.bf16.mxu1 %v1823_v62  ;;  %v2048_v53 = vsel %vm1295_vm2, 0, %v1606_v22  ;;  %v2049_v4 = vsel %vm1296_vm5, 0, %v1607_v15  ;;  %v1868_v11 = vshll.u32 %v1632_v52, 16  ;;  %v4275_v39 = vld [vmem:[%s4384_s4] ss:$0 sm:$0xff] }
 0x1c3   : > { %v1867_v56 = vrot.slane %v1865_v33, 7  ;;  %2822 = vmatprep.subr.bf16.mxu1 %v3049_v25  ;;  %v2111_v13 = vsel %vm647_vm3, %v2106_v18, %v2110_v2  ;;  %v2116_v8 = vshll.u32 %v2048_v53, 16  ;;  %v2124_v3 = vshll.u32 %v2049_v4, 16  ;;  %v2331_v15 = vld [vmem:[%s3435_s6 + $0x18] sm:$0xff]  ;;  %v2329_v22 = vld [vmem:[%s3435_s6 + $0x8] sm:$0xff]  ;;  %v2334_v48 = vld [vmem:[%s3435_s6 + $0x30] sm:$0xff] }
 0x1c4   : > { %v1878_v32 = vor.u32 %v1876_v27, %v1875_v43  ;;  %v2114_v28 = vor.u32 %v2112_v12, %v2110_v2  ;;  %v2120_v63 = vshrl.u32 %v2048_v53, 16  ;;  %v2332_v33 = vld [vmem:[%s3435_s6 + $0x20] sm:$0xff]  ;;  %v2335_v12 = vld [vmem:[%s3435_s6 + $0x38] sm:$0xff] }
 0x1c5   : > { %v1870_v26 = vor.u32 %v1868_v11, %v1867_v56  ;;  %v2118_v41 = vrot.slane %v2116_v8, 1  ;;  %v2126_v14 = vrot.slane %v2124_v3, 1 }
 0x1c6   : > { %2823 = vmatpush3.bf16.msra.mxu1 %v3049_v25  ;;  %v1879_v54 = vsel %vm907_vm11, %v1867_v56, %v1878_v32 }
 0x1c7   : > { %2840 = vmatprep.subr.bf16.mxu1 %v3050_v44  ;;  %v1871_v36 = vsel %vm907_vm11, %v1859_v59, %v1870_v26  ;;  %v2119_v29 = vsel %vm647_vm3, %v2114_v28, %v2118_v41  ;;  %v2122_v34 = vor.u32 %v2120_v63, %v2118_v41  ;;  %v2338_v41 = vld [vmem:[%s3435_s6 + $0x50] sm:$0xff] }
 0x1c9   : > { %2825 = vmatmul.mubr.bf16.vlgmr.msra.gmra.mrb[0].mxu1 %v4192_v50  ;;  %v2127_v57 = vsel %vm647_vm3, %v2122_v34, %v2126_v14  ;;  %v3056_v50 = vld [vmem:[#allocation8 + $0xb0] sm:$0xff]   ;;  %v2339_v34 = vld [vmem:[%s3435_s6 + $0x58] sm:$0xff] }
 0x1ca   : > { %2828 = vmatprep.mubr.bf16.mxu1 %v4223_v20  ;;  %2841 = vmatpush3.bf16.msra.mxu1 %v3050_v44  ;;  %v3057_v20 = vld [vmem:[#allocation8 + $0xb8] sm:$0xff]  }
 0x1cb   : > { %2842 = vmatprep.subr.bf16.mxu1 %v3051_v37 }
 0x1ce   : > { %2843 = vmatpush3.bf16.msra.mxu1 %v3051_v37  ;;  %v2336_v37 = vld [vmem:[%s3435_s6 + $0x40] sm:$0xff] }
 0x1cf   : > { %2844 = vmatprep.subr.bf16.mxu1 %v3052_v49 }
 0x1d1   : > { %2829 = vmatmul.mubr.bf16.gmra.mrb[4].mxu1 %v4216_v42  ;;  %v2041_v42 = vld [vmem:[#allocation2 + $0x48] sm:$0x1] }
 0x1d2   : > { %2832 = vmatprep.mubr.bf16.mxu1 %v1855_v1  ;;  %2845 = vmatpush3.bf16.msra.mxu1 %v3052_v49  ;;  %v2050_v10 = vsel %vm1297_vm7, 0, %v2041_v42 }
 0x1d3   : > { %2846 = vmatprep.subr.bf16.mxu1 %v3053_v38  ;;  %v2132_v59 = vshll.u32 %v2050_v10, 16 }
 0x1d5   : > { %v2134_v60 = vrot.slane %v2132_v59, 1 }
 0x1d6   : > { %2847 = vmatpush3.bf16.msra.mxu1 %v3053_v38  ;;  %v2337_v38 = vld [vmem:[%s3435_s6 + $0x48] sm:$0xff] }
 0x1d7   : > { %2848 = vmatprep.subr.bf16.mxu1 %v3054_v21 }
 0x1d9   : > { %2833 = vmatmul.mubr.bf16.gmra.mrb[8].mxu1 %v1863_v30 }
 0x1da   : > { %2836 = vmatprep.mubr.bf16.mxu1 %v1871_v36  ;;  %2849 = vmatpush3.bf16.msra.mxu1 %v3054_v21 }
 0x1db   : > { %2850 = vmatprep.subr.bf16.mxu1 %v3055_v35 }
 0x1de   : > { %2851 = vmatpush3.bf16.msra.mxu1 %v3055_v35 }
 0x1df   : > { %2852 = vmatprep.subr.bf16.mxu1 %v3056_v50 }
 0x1e1   : > { %2837 = vmatmul.mubr.bf16.gmra.mrb[12].mxu1 %v1879_v54 }
 0x1e2   : > { %2853 = vmatpush3.bf16.msra.mxu1 %v3056_v50  ;;  %2856 = vmatprep.mubr.bf16.mxu1 %v4208_v40  ;;  %v2128_v40 = vshrl.u32 %v2049_v4, 16  ;;  %v2333_v4 = vld [vmem:[%s3435_s6 + $0x28] sm:$0xff] }
 0x1e3   : > { %2854 = vmatprep.subr.bf16.mxu1 %v3057_v20 }
 0x1e4   : > { %v2130_v46 = vor.u32 %v2128_v40, %v2126_v14 }
 0x1e6   : > { %2855 = vmatpush3.bf16.msra.mxu1 %v3057_v20 }
 0x1e9   : > { %2857 = vmatmul.mubr.bf16.vlgmr.msra.gmra.mrb[0].mxu1 %v4231_v16  ;;  %v2135_v16 = vsel %vm647_vm3, %v2130_v46, %v2134_v60  ;;  %v2342_v60 = vld [vmem:[%s3435_s6 + $0x70] sm:$0xff] }
 0x1ea   : > { %2860 = vmatprep.mubr.bf16.mxu1 %v4236_v58 }
 0x1f1   : > { %2861 = vmatmul.mubr.bf16.gmra.mrb[4].mxu1 %v4251_v17 }
 0x1f2   : > { %2864 = vmatprep.mubr.bf16.mxu1 %v2111_v13 }
 0x1f9   : > { %2865 = vmatmul.mubr.bf16.gmra.mrb[8].mxu1 %v2119_v29 }
 0x1fa   : > { %2868 = vmatprep.mubr.bf16.mxu1 %v2127_v57 }
 0x201   : > { %2869 = vmatmul.mubr.bf16.gmra.mrb[12].mxu1 %v2135_v16 }
 0x2bc   : > { %v2858_v23 = vpop.f32.mrb[0].mxu1 }
 0x2bd   : > { %v2314_v31 = vadd.f32 %v2858_v23, %v4275_v39  ;;  %v2226_v5 = vpop.f32.mrb[1].mxu1 }
 0x2be   : > { %v2312_v24 = vadd.f32 %v4275_v39, %v2226_v5  ;;  %v2859_v9 = vpop.f32.mrb[2].mxu1 }
 0x2bf   : > { %v2346_v45 = vadd.f32 %v2330_v0, %v2314_v31  ;;  %v2315_v58 = vadd.f32 %v2859_v9, %v4275_v39  ;;  %v2229_v6 = vpop.f32.mrb[3].mxu1  ;;  %v2340_v0 = vld [vmem:[%s3435_s6 + $0x60] sm:$0xff] }
 0x2c0   : > { %v2344_v30 = vadd.f32 %v2328_v47, %v2312_v24  ;;  %v2313_v61 = vadd.f32 %v4275_v39, %v2229_v6  ;;  %v2343_v47 = vld [vmem:[%s3435_s6 + $0x78] sm:$0xff] }
 0x2c1   : > { %v2362_v51 = vmax.f32 %v2346_v45, 0.0  ;;  %v2347_v7 = vadd.f32 %v2331_v15, %v2315_v58  ;;  %v2341_v45 = vld [vmem:[%s3435_s6 + $0x68] sm:$0xff] }
 0x2c2   : > { %v2360_v25 = vmax.f32 %v2344_v30, 0.0  ;;  %v2345_v1 = vadd.f32 %v2329_v22, %v2313_v61 }
 0x2c3   : > { %2378 = vst [vmem:[%s4287_s11 + $0x10] sm:$0xff] %v2362_v51  ;;  %v2363_v55 = vmax.f32 %v2347_v7, 0.0 }
 0x2c4   : > { %2376 = vst [vmem:[%s4287_s11] sm:$0xff] %v2360_v25  ;;  %v2361_v19 = vmax.f32 %v2345_v1, 0.0  ;;  %v2862_v52 = vpop.f32.mrb[4].mxu1 }
 0x2c5   : > { %2379 = vst [vmem:[%s4287_s11 + $0x18] sm:$0xff] %v2363_v55  ;;  %v2318_v62 = vadd.f32 %v2862_v52, %v4275_v39  ;;  %v2242_v17 = vpop.f32.mrb[5].mxu1 }
 0x2c6   : > { %2377 = vst [vmem:[%s4287_s11 + $0x8] sm:$0xff] %v2361_v19  ;;  %v2316_v18 = vadd.f32 %v4275_v39, %v2242_v17  ;;  %v2863_v2 = vpop.f32.mrb[6].mxu1 }
 0x2c7   : > { %v2350_v43 = vadd.f32 %v2334_v48, %v2318_v62  ;;  %v2319_v27 = vadd.f32 %v2863_v2, %v4275_v39  ;;  %v2245_v53 = vpop.f32.mrb[7].mxu1 }
 0x2c8   : > { %v2348_v56 = vadd.f32 %v2332_v33, %v2316_v18  ;;  %v2317_v11 = vadd.f32 %v4275_v39, %v2245_v53 }
 0x2c9   : > { %v2366_v44 = vmax.f32 %v2350_v43, 0.0  ;;  %v2351_v13 = vadd.f32 %v2335_v12, %v2319_v27 }
 0x2ca   : > { %v2364_v8 = vmax.f32 %v2348_v56, 0.0  ;;  %v2349_v32 = vadd.f32 %v2333_v4, %v2317_v11 }
 0x2cb   : > { %2382 = vst [vmem:[%s4287_s11 + $0x30] sm:$0xff] %v2366_v44  ;;  %v2367_v3 = vmax.f32 %v2351_v13, 0.0 }
 0x2cc   : > { %2380 = vst [vmem:[%s4287_s11 + $0x20] sm:$0xff] %v2364_v8  ;;  %v2365_v26 = vmax.f32 %v2349_v32, 0.0  ;;  %v2866_v28 = vpop.f32.mrb[8].mxu1 }
 0x2cd   : > { %2383 = vst [vmem:[%s4287_s11 + $0x38] sm:$0xff] %v2367_v3  ;;  %v2322_v63 = vadd.f32 %v2866_v28, %v4275_v39  ;;  %v2258_v54 = vpop.f32.mrb[9].mxu1 }
 0x2ce   : > { %2381 = vst [vmem:[%s4287_s11 + $0x28] sm:$0xff] %v2365_v26  ;;  %v2320_v36 = vadd.f32 %v4275_v39, %v2258_v54  ;;  %v2867_v29 = vpop.f32.mrb[10].mxu1 }
 0x2cf   : > { %v2354_v14 = vadd.f32 %v2338_v41, %v2322_v63  ;;  %v2323_v57 = vadd.f32 %v2867_v29, %v4275_v39  ;;  %v2261_v49 = vpop.f32.mrb[11].mxu1 }
 0x2d0   : > { %v2352_v21 = vadd.f32 %v2336_v37, %v2320_v36  ;;  %v2321_v35 = vadd.f32 %v4275_v39, %v2261_v49 }
 0x2d1   : > { %v2370_v50 = vmax.f32 %v2354_v14, 0.0  ;;  %v2355_v20 = vadd.f32 %v2339_v34, %v2323_v57 }
 0x2d2   : > { %v2368_v42 = vmax.f32 %v2352_v21, 0.0  ;;  %v2353_v10 = vadd.f32 %v2337_v38, %v2321_v35 }
 0x2d3   : > { %2386 = vst [vmem:[%s4287_s11 + $0x50] sm:$0xff] %v2370_v50  ;;  %v2371_v59 = vmax.f32 %v2355_v20, 0.0 }
 0x2d4   : > { %2384 = vst [vmem:[%s4287_s11 + $0x40] sm:$0xff] %v2368_v42  ;;  %v2369_v40 = vmax.f32 %v2353_v10, 0.0  ;;  %v2870_v46 = vpop.f32.mrb[12].mxu1 }
 0x2d5   : > { %2387 = vst [vmem:[%s4287_s11 + $0x58] sm:$0xff] %v2371_v59  ;;  %v2326_v16 = vadd.f32 %v2870_v46, %v4275_v39  ;;  %v2274_v23 = vpop.f32.mrb[13].mxu1 }
 0x2d6   : > { %2385 = vst [vmem:[%s4287_s11 + $0x48] sm:$0xff] %v2369_v40  ;;  %v2324_v31 = vadd.f32 %v4275_v39, %v2274_v23  ;;  %v2871_v5 = vpop.f32.mrb[14].mxu1 }
 0x2d7   : > { %v2358_v24 = vadd.f32 %v2342_v60, %v2326_v16  ;;  %v2327_v9 = vadd.f32 %v2871_v5, %v4275_v39  ;;  %v2277_v15 = vpop.f32.mrb[15].mxu1 }
 0x2d8   : > { %v2356_v58 = vadd.f32 %v2340_v0, %v2324_v31  ;;  %v2325_v6 = vadd.f32 %v4275_v39, %v2277_v15 }
 0x2d9   : > { %v2374_v22 = vmax.f32 %v2358_v24, 0.0  ;;  %v2359_v30 = vadd.f32 %v2343_v47, %v2327_v9 }
 0x2da   : > { %v2372_v61 = vmax.f32 %v2356_v58, 0.0  ;;  %v2357_v51 = vadd.f32 %v2341_v45, %v2325_v6 }
 0x2db   : > { %2390 = vst [vmem:[%s4287_s11 + $0x70] sm:$0xff] %v2374_v22  ;;  %v2375_v7 = vmax.f32 %v2359_v30, 0.0 }
 0x2dc   : > { %2388 = vst [vmem:[%s4287_s11 + $0x60] sm:$0xff] %v2372_v61  ;;  %v2373_v39 = vmax.f32 %v2357_v51, 0.0 }
 0x2dd   : > { %2391 = vst [vmem:[%s4287_s11 + $0x78] sm:$0xff] %v2375_v7 }
 0x2de   : > { %2389 = vst [vmem:[%s4287_s11 + $0x68] sm:$0xff] %v2373_v39 }
 0x2df   : > { %3157 = shalt.err (!%p3154_p2)
}
 0x2e0   : > { %s3158_s6 = scalar_lea.hbm %s4331_s9, 2048  ;;  %s3162_s8 = scalar_lea.hbm %s4385_s5, 4096 }
 0x2e1   : > { %p3159_p13 = scmp.ne.s32.totalorder %s4331_s9, %s3158_s6  ;;  %p3163_p4 = scmp.lt.u32.totalorder %s4331_s9, %s4385_s5 }
 0x2e2   : > { %p3164_p5 = scmp.lt.u32.totalorder %s3162_s8, %s3158_s6  ;;  %p3166_p11 = scmp.lt.u32.totalorder %s3158_s6, %s4331_s9 }
 0x2e3   : > { %p3160_p6 = pnand %p3159_p13, %p4471_p0 }
 0x2e4   : > { %p3165_p8 = por %p3164_p5, %p3163_p4 }
 0x2e5   : > { %p3161_p10 = pneg %p3160_p6 }
 0x2e6   : > { %p3167_p1 = por %p3166_p11, %p3165_p8 }
 0x2e8   : > { %p3168_p3 = pnand %p3167_p1, %p3161_p10 }
 0x2ea   : > { %3171 = shalt.err (!%p3168_p3)
}
 0x2eb   : > { %s3225_s28 = smov 128   ;;  %s3226_s15 = smov 8  }
 0x2ec   : > { %2946 = dma.vmem_to_hbm [thread:$0]  (%p4471_p0), %s4333_s30, 2048, %s4331_s9, %s2393_s22, %s3225_s28, %s3225_s28, %s3226_s15  }
 0x2ed PF: > { %s2421_s16 = sand.u32 1, %s3202_s18   ;;  %p4472_p7 = scmp.ne.s32.totalorder %s4397_s25, 0 }
 0x2ee   : > { %p4473_p9 = scmp.ge.s32.totalorder %s3214_s21, 2  ;;  %s2422_s12 = scalar_lea.sflag [#allocation5], %s2421_s16 }
 0x2f0   : > { %p2960_p12 = pnand %p4473_p9, %p4472_p7 }
 0x2f2   : > { %3197 = dma.done.wait (!%p2960_p12), %s2422_s12, 2048  }
 0x2f3   : > { %3199 = vsyncadd (!%p2960_p12), %s2422_s12, 4294965248  ;;  %p19_p2 = scmp.ge.s32.totalorder %s3367_s14, 4   ;;  %s4474_s18 = smov %s3206_s19 }
 0x2f4   : > { %s4475_s19 = smov %s3210_s20  ;;  %s4476_s20 = smov %s3383_s27 }
 0x2f5   : > { %s4477_s21 = smov %s3367_s14  ;;  %21 = sbr.rel (!%p19_p2) target bundleno = 6 (0x6), region = 97 }
 0x2fc   :  { %2427 = vsyncpa [#allocation4], 1 }
 0x2fd   :  { %2429 = vsyncpa [#allocation4 + $0x1], 1 }
 0x2fe   :  { %2430 = vsyncpa [#allocation7], 1 }
 0x2ff   :  { %2431 = vsyncpa [#allocation5], 1 }
 0x300   :  { %2433 = vsyncpa [#allocation5 + $0x1], 1 }

</bundles_post_ra>
